<compile_context>
chip_gen: v5e
topology: v5e:2x2
jax: 0.10.0
libtpu: 0.0.40
codegen_flags: <defaults>
</compile_context>

<pallas_src>
import jax
import jax.numpy as jnp
from jax.experimental import pallas as pl
from jax.experimental.pallas import tpu as pltpu

IN_F, HID, OUT_F = 1000, 512, 2
K_PAD = 1024     # contraction dim padded to a multiple of 128 (inside kernel)
OUT_PAD = 128    # output lanes padded to 128 for lane-dense, unmasked stores


def _round_up(a, m):
    return ((a + m - 1) // m) * m


def mlp_kernel(x_ref, w1_ref, b1_ref, w2_ref, b2_ref, y_ref, xpad_ref):
    # Cast the f32 x tile to bf16 and zero-pad K 1000 -> 1024 inside VMEM so
    # both MXU passes see clean 8x128-aligned operands.  The 24-lane tail is
    # re-zeroed every step (tb x 24 bf16 -- trivial) so it stays correct even
    # when the grid is split across TensorCores (megacore).
    xpad_ref[:, IN_F:] = jnp.zeros((x_ref.shape[0], K_PAD - IN_F), jnp.bfloat16)
    xpad_ref[:, :IN_F] = x_ref[...].astype(jnp.bfloat16)

    h = jnp.dot(xpad_ref[...], w1_ref[...], preferred_element_type=jnp.float32)
    h = jnp.maximum(h + b1_ref[...], 0.0)                       # f32 bias + ReLU
    y = jnp.dot(h.astype(jnp.bfloat16), w2_ref[...],
                preferred_element_type=jnp.float32) + b2_ref[...]
    y_ref[...] = y.astype(y_ref.dtype)                          # bf16 writeback


def prepare_params(w1, b1, w2, b2):
    """Pad / cast torch-layout params once (outside the hot path).

    w1: (IN_F, HID)  -> (K_PAD, HID)   bf16  (extra K rows are zero)
    b1: (HID,)       -> (1, HID)       f32
    w2: (HID, OUT_F) -> (HID, OUT_PAD) bf16  (extra output lanes are zero)
    b2: (OUT_F,)     -> (1, OUT_PAD)   f32   (extra output lanes are zero)
    """
    w1p = jnp.zeros((K_PAD, HID), jnp.bfloat16).at[:IN_F, :].set(
        w1.astype(jnp.bfloat16))
    b1p = b1.astype(jnp.float32).reshape(1, HID)
    w2p = jnp.zeros((HID, OUT_PAD), jnp.bfloat16).at[:, :OUT_F].set(
        w2.astype(jnp.bfloat16))
    b2p = jnp.zeros((1, OUT_PAD), jnp.float32).at[0, :OUT_F].set(
        b2.astype(jnp.float32))
    return w1p, b1p, w2p, b2p


def mlp_forward(x, w1p, b1p, w2p, b2p, *, block_b=1024):
    """x: (B, 1000) float32 (or bfloat16). Returns (B, 2) float32."""
    B = x.shape[0]

    if B <= 16:
        tb = B                        # single block == full array dims (legal)
    else:
        # >= 2 grid steps (keeps both v7x TCs busy), tile a multiple of 16,
        # capped at block_b.  VMEM at tb=1024: ~8 MiB x (2 bufs, f32) +
        # ~2 MiB scratch + ~1.2 MiB weights + ~0.5 MiB out -- fits every chip.
        tb = min(block_b, max(16, _round_up(-(-B // 2), 16)))
    num_blocks = -(-B // tb)          # partial edge block is masked by Pallas

    resident = dict(pipeline_mode=pl.Buffered(1))   # constant-index blocks

    y_pad = pl.pallas_call(
        mlp_kernel,
        out_shape=jax.ShapeDtypeStruct((B, OUT_PAD), jnp.bfloat16),
        grid=(num_blocks,),
        in_specs=[
            pl.BlockSpec((tb, IN_F), lambda i: (i, 0)),                 # x (streamed)
            pl.BlockSpec((K_PAD, HID), lambda i: (0, 0), **resident),   # w1
            pl.BlockSpec((1, HID), lambda i: (0, 0), **resident),       # b1
            pl.BlockSpec((HID, OUT_PAD), lambda i: (0, 0), **resident), # w2
            pl.BlockSpec((1, OUT_PAD), lambda i: (0, 0), **resident),   # b2
        ],
        out_specs=pl.BlockSpec((tb, OUT_PAD), lambda i: (i, 0)),
        scratch_shapes=[pltpu.VMEM((tb, K_PAD), jnp.bfloat16)],
        compiler_params=pltpu.CompilerParams(
            dimension_semantics=("parallel",),
            vmem_limit_bytes=32 * 1024 * 1024),
    )(x, w1p, b1p, w2p, b2p)

    return y_pad[:B, :OUT_F].astype(jnp.float32)


def init_params(key):
    # torch.nn.Linear default init: U(-1/sqrt(fan_in), 1/sqrt(fan_in)).
    k1, k2, k3, k4 = jax.random.split(key, 4)
    lim1 = 1.0 / jnp.sqrt(float(IN_F))
    lim2 = 1.0 / jnp.sqrt(float(HID))
    w1 = jax.random.uniform(k1, (IN_F, HID), jnp.float32, -lim1, lim1)   # (in, out)
    b1 = jax.random.uniform(k2, (HID,), jnp.float32, -lim1, lim1)
    w2 = jax.random.uniform(k3, (HID, OUT_F), jnp.float32, -lim2, lim2)  # (in, out)
    b2 = jax.random.uniform(k4, (OUT_F,), jnp.float32, -lim2, lim2)
    return w1, b1, w2, b2


if __name__ == "__main__":
    key = jax.random.PRNGKey(0)
    kx, kp = jax.random.split(key)

    B = 8
    x = jax.random.normal(kx, (B, IN_F), jnp.float32)
    w1, b1, w2, b2 = init_params(kp)
    w1p, b1p, w2p, b2p = prepare_params(w1, b1, w2, b2)

    y = mlp_forward(x, w1p, b1p, w2p, b2p)
    y = jax.block_until_ready(y)
    assert y.shape == (B, OUT_F), y.shape

    # Pure-JAX reference with matching bf16-input / f32-accumulate math and a
    # final bf16 rounding (the kernel writes its padded output in bf16).
    h_ref = jnp.maximum(
        jnp.dot(x.astype(jnp.bfloat16), w1.astype(jnp.bfloat16),
                preferred_element_type=jnp.float32) + b1, 0.0)
    y_ref = jnp.dot(h_ref.astype(jnp.bfloat16), w2.astype(jnp.bfloat16),
                    preferred_element_type=jnp.float32) + b2
    y_ref = y_ref.astype(jnp.bfloat16).astype(jnp.float32)
    assert jnp.allclose(y, y_ref, atol=2e-2, rtol=2e-2), \
        float(jnp.max(jnp.abs(y - y_ref)))

    print("KERNEL_OK")
</pallas_src>

<mosaic_0001>
module attributes {stable_mosaic.version = 11 : i64} {
  func.func @mlp_kernel(%arg0: i32, %arg1: memref<8x1000xf32, #tpu.memory_space<vmem>>, %arg2: memref<1024x512xbf16, #tpu.memory_space<vmem>>, %arg3: memref<1x512xf32, #tpu.memory_space<vmem>>, %arg4: memref<512x128xbf16, #tpu.memory_space<vmem>>, %arg5: memref<1x128xf32, #tpu.memory_space<vmem>>, %arg6: memref<8x128xbf16, #tpu.memory_space<vmem>>, %arg7: memref<8x1024xbf16, #tpu.memory_space<vmem>>) attributes {dimension_semantics = [#tpu.dimension_semantics<parallel>], iteration_bounds = array<i64: 1>, scalar_prefetch = 0 : i64, scratch_operands = 1 : i64, tpu.core_type = #tpu.core_type<tc>, window_params = [{transform_indices = @transform_0, window_bounds = array<i64: 8, 1000>}, {pipeline_mode = #tpu.pipeline_mode<synchronous>, transform_indices = @transform_1, window_bounds = array<i64: 1024, 512>}, {pipeline_mode = #tpu.pipeline_mode<synchronous>, transform_indices = @transform_2, window_bounds = array<i64: 1, 512>}, {pipeline_mode = #tpu.pipeline_mode<synchronous>, transform_indices = @transform_3, window_bounds = array<i64: 512, 128>}, {pipeline_mode = #tpu.pipeline_mode<synchronous>, transform_indices = @transform_4, window_bounds = array<i64: 1, 128>}, {transform_indices = @transform_5, window_bounds = array<i64: 8, 128>}]} {
    %cst = arith.constant 0.000000e+00 : bf16
    %0 = vector.broadcast %cst : bf16 to vector<8x24xbf16>
    %c0 = arith.constant 0 : index
    %c1000 = arith.constant 1000 : index
    %1 = vector.load %arg7[%c0, %c1000] : memref<8x1024xbf16, #tpu.memory_space<vmem>>, vector<8x24xbf16>
    tpu.vector_store %arg7[%c0, %c1000], %0 {strides = array<i32>} : memref<8x1024xbf16, #tpu.memory_space<vmem>>, vector<8x24xbf16>,
    %c0_0 = arith.constant 0 : index
    %c0_1 = arith.constant 0 : index
    %2 = vector.load %arg1[%c0_0, %c0_1] : memref<8x1000xf32, #tpu.memory_space<vmem>>, vector<8x1000xf32>
    %3 = arith.truncf %2 : vector<8x1000xf32> to vector<8x1000xbf16>
    %c0_2 = arith.constant 0 : index
    %c0_3 = arith.constant 0 : index
    %4 = vector.load %arg7[%c0_2, %c0_3] : memref<8x1024xbf16, #tpu.memory_space<vmem>>, vector<8x1000xbf16>
    tpu.vector_store %arg7[%c0_2, %c0_3], %3 {strides = array<i32>} : memref<8x1024xbf16, #tpu.memory_space<vmem>>, vector<8x1000xbf16>,
    %c0_4 = arith.constant 0 : index
    %c0_5 = arith.constant 0 : index
    %5 = vector.load %arg7[%c0_4, %c0_5] : memref<8x1024xbf16, #tpu.memory_space<vmem>>, vector<8x1024xbf16>
    %c0_6 = arith.constant 0 : index
    %c0_7 = arith.constant 0 : index
    %6 = vector.load %arg2[%c0_6, %c0_7] : memref<1024x512xbf16, #tpu.memory_space<vmem>>, vector<1024x512xbf16>
    %cst_8 = arith.constant dense<0.000000e+00> : vector<8x512xf32>
    %7 = tpu.matmul %5, %6, %cst_8 {dimension_numbers = #tpu.dot_dimension_numbers<[1], [0], [0], [1], [0, 0, 1, 1], [], []>} : vector<8x1024xbf16>, vector<1024x512xbf16>, vector<8x512xf32> -> vector<8x512xf32>
    %c0_9 = arith.constant 0 : index
    %c0_10 = arith.constant 0 : index
    %8 = vector.load %arg3[%c0_9, %c0_10] : memref<1x512xf32, #tpu.memory_space<vmem>>, vector<1x512xf32>
    %9 = vector.broadcast %8 : vector<1x512xf32> to vector<8x512xf32>
    %10 = arith.addf %7, %9 : vector<8x512xf32>
    %cst_11 = arith.constant 0.000000e+00 : f32
    %11 = vector.broadcast %cst_11 : f32 to vector<8x512xf32>
    %12 = arith.maximumf %10, %11 : vector<8x512xf32>
    %13 = arith.truncf %12 : vector<8x512xf32> to vector<8x512xbf16>
    %c0_12 = arith.constant 0 : index
    %c0_13 = arith.constant 0 : index
    %14 = vector.load %arg4[%c0_12, %c0_13] : memref<512x128xbf16, #tpu.memory_space<vmem>>, vector<512x128xbf16>
    %cst_14 = arith.constant dense<0.000000e+00> : vector<8x128xf32>
    %15 = tpu.matmul %13, %14, %cst_14 {dimension_numbers = #tpu.dot_dimension_numbers<[1], [0], [0], [1], [0, 0, 1, 1], [], []>} : vector<8x512xbf16>, vector<512x128xbf16>, vector<8x128xf32> -> vector<8x128xf32>
    %c0_15 = arith.constant 0 : index
    %c0_16 = arith.constant 0 : index
    %16 = vector.load %arg5[%c0_15, %c0_16] : memref<1x128xf32, #tpu.memory_space<vmem>>, vector<1x128xf32>
    %17 = vector.broadcast %16 : vector<1x128xf32> to vector<8x128xf32>
    %18 = arith.addf %15, %17 : vector<8x128xf32>
    %19 = arith.truncf %18 : vector<8x128xf32> to vector<8x128xbf16>
    %c0_17 = arith.constant 0 : index
    %c0_18 = arith.constant 0 : index
    %20 = vector.load %arg6[%c0_17, %c0_18] : memref<8x128xbf16, #tpu.memory_space<vmem>>, vector<8x128xbf16>
    tpu.vector_store %arg6[%c0_17, %c0_18], %19 {strides = array<i32>} : memref<8x128xbf16, #tpu.memory_space<vmem>>, vector<8x128xbf16>,
    return
  }
  func.func @transform_0(%arg0: i32) -> (i32, i32) {
    %c0_i32 = arith.constant 0 : i32
    %c0_i32_0 = arith.constant 0 : i32
    return %arg0, %c0_i32 : i32, i32
  }
  func.func @transform_1(%arg0: i32) -> (i32, i32) {
    %c0_i32 = arith.constant 0 : i32
    %c0_i32_0 = arith.constant 0 : i32
    %c0_i32_1 = arith.constant 0 : i32
    return %c0_i32, %c0_i32_0 : i32, i32
  }
  func.func @transform_2(%arg0: i32) -> (i32, i32) {
    %c0_i32 = arith.constant 0 : i32
    %c0_i32_0 = arith.constant 0 : i32
    %c0_i32_1 = arith.constant 0 : i32
    return %c0_i32, %c0_i32_0 : i32, i32
  }
  func.func @transform_3(%arg0: i32) -> (i32, i32) {
    %c0_i32 = arith.constant 0 : i32
    %c0_i32_0 = arith.constant 0 : i32
    %c0_i32_1 = arith.constant 0 : i32
    return %c0_i32, %c0_i32_0 : i32, i32
  }
  func.func @transform_4(%arg0: i32) -> (i32, i32) {
    %c0_i32 = arith.constant 0 : i32
    %c0_i32_0 = arith.constant 0 : i32
    %c0_i32_1 = arith.constant 0 : i32
    return %c0_i32, %c0_i32_0 : i32, i32
  }
  func.func @transform_5(%arg0: i32) -> (i32, i32) {
    %c0_i32 = arith.constant 0 : i32
    %c0_i32_0 = arith.constant 0 : i32
    return %arg0, %c0_i32 : i32, i32
  }
}

</mosaic_0001>

<bundles_post_ra>
// kernel: tpu_custom_call.1
= control target key start
LH: loop header
LB: loop body
LE: loop exit
PB: predicated region body
PF: predicated region fallthrough
CT: control target
= control target key end

     0   :  { %10 = vsyncpa [#allocation4], 0  ;;  %s4146_s0 = inlined_call_operand.hbm [shape: f32[8,1000], index: 0, kind: input, shape index: {}]   ;;  %s4147_s1 = inlined_call_operand.hbm [shape: bf16[1024,512], index: 1, kind: input, shape index: {}]   ;;  %s4148_s2 = inlined_call_operand.hbm [shape: f32[1,512], index: 2, kind: input, shape index: {}]   ;;  %s4149_s3 = inlined_call_operand.hbm [shape: bf16[512,128], index: 3, kind: input, shape index: {}]   ;;  %s4150_s4 = inlined_call_operand.vmem [shape: f32[1,128], index: 4, kind: input, shape index: {}]   ;;  %s4151_s5 = inlined_call_operand.hbm [shape: bf16[8,128], index: 5, kind: output, shape index: {}]  }
   0x1   :  { %11 = vsyncpa [#allocation7], 0 }
   0x2   :  { %12 = vsyncpa [#allocation10], 0  ;;  %s29_s20 = sshll.u32 %s4147_s1, 4  ;;  %s30_s20 = int_to_ptr.hbm [resolvable:$true] %s29_s20 }
   0x3   :  { %13 = vsyncpa [#allocation5], 0  ;;  %s4016_s21 = smov [#allocation6]   ;;  %s19_s25 = sshll.u32 %s4146_s0, 4  ;;  %s20_s25 = int_to_ptr.hbm [resolvable:$true] %s19_s25 }
   0x4   :  { %s31_s22 = sshll.u32 %s4016_s21, 4  ;;  %s4017_s26 = smov 256   ;;  %s32_s22 = int_to_ptr.vmem [resolvable:$true] %s31_s22 }
   0x5   :  { %s4018_s27 = smov 16   ;;  %s4019_s28 = smov [#allocation3]  }
   0x6   :  { %37 = dma.hbm_to_vmem [thread:$0]  %s30_s20, 32768, %s32_s22, [#allocation7], %s4017_s26, %s4017_s26, %s4018_s27  }
   0x7   :  { %s21_s29 = sshll.u32 %s4019_s28, 4  ;;  %s43_s7 = sshll.u32 %s4148_s2, 4  ;;  %s22_s29 = int_to_ptr.vmem [resolvable:$true] %s21_s29  ;;  %s44_s7 = int_to_ptr.hbm [resolvable:$true] %s43_s7 }
   0x8   :  { %24 = dma.hbm_to_vmem [thread:$0]  %s20_s25, 1024, %s22_s29, [#allocation4]  }
   0x9   :  { %s53_s9 = sshll.u32 %s4149_s3, 4  ;;  %s4020_s10 = smov [#allocation8]   ;;  %s54_s9 = int_to_ptr.hbm [resolvable:$true] %s53_s9 }
   0xa   :  { %s45_s11 = sshll.u32 %s4020_s10, 4  ;;  %s4021_s0 = smov [#allocation9]   ;;  %s46_s11 = int_to_ptr.vmem [resolvable:$true] %s45_s11 }
   0xb   :  { %48 = dma.hbm_to_vmem [thread:$0]  %s44_s7, 64, %s46_s11, [#allocation7]  }
   0xc   :  { %s55_s12 = sshll.u32 %s4021_s0, 4  ;;  %s4022_s13 = smov 64   ;;  %s56_s12 = int_to_ptr.vmem [resolvable:$true] %s55_s12 }
   0xd   :  { %s4023_s14 = smov 4  }
   0xe   :  { %61 = dma.hbm_to_vmem [thread:$0]  %s54_s9, 4096, %s56_s12, [#allocation10], %s4022_s13, %s4022_s13, %s4023_s14  }
   0xf   :  { %4008 = dma.done.wait [#allocation4], 1024  }
  0x10   :  { %4009 = vsyncadd [#allocation4], 4294966272 }
  0x11   :  { %4010 = dma.done.wait [#allocation7], 32832  }
  0x12   :  { %4011 = vsyncadd [#allocation7], 4294934464 }
  0x13   :  { %4012 = dma.done.wait [#allocation10], 4096  }
  0x14   :  { %4013 = vsyncadd [#allocation10], 4294963200  ;;  %v2551_v0 = vld [vmem:[#allocation6 + $0xe0] sm:$0xf]  ;;  %v3619_v1 = vld [vmem:[#allocation6 + $0xec] sm:$0xf0] }
  0x15   :  { %v2679_v2 = vld [vmem:[#allocation6 + $0x1e0] sm:$0xf]  ;;  %v2552_v3 = vor.u32 %v3619_v1, %v2551_v0  ;;  %v3651_v4 = vld [vmem:[#allocation6 + $0x1ec] sm:$0xf0]  ;;  %vm81_vm0 = vcmask 1044288   ;;  %vm98_vm1 = vcmask 1043456  }
  0x16   :  { %v2807_v5 = vld [vmem:[#allocation6 + $0x2e0] sm:$0xf]  ;;  %v3683_v6 = vld [vmem:[#allocation6 + $0x2ec] sm:$0xf0]  ;;  %v2680_v7 = vor.u32 %v3651_v4, %v2679_v2  ;;  %vm99_vm2 = vcmask 850948   ;;  %s4025_s15 = smov [#allocation11]  }
  0x17   :  { %v2808_v8 = vor.u32 %v3683_v6, %v2807_v5  ;;  %v2935_v9 = vld [vmem:[#allocation6 + $0x3e0] sm:$0xf]  ;;  %v3715_v10 = vld [vmem:[#allocation6 + $0x3ec] sm:$0xf0]  ;;  %1680 = vmatpush.bf16.msra.mxu0 %v2552_v3  ;;  %vm100_vm3 = vmor %vm99_vm2, %vm98_vm1  ;;  %s2423_s16 = sshll.u32 %s4025_s15, 4  ;;  %s2425_s19 = sshll.u32 %s4151_s5, 4  ;;  %s2424_s16 = int_to_ptr.vmem [resolvable:$true] %s2423_s16  ;;  %s2426_s19 = int_to_ptr.hbm [resolvable:$true] %s2425_s19 }
  0x18   :  { %v2535_v11 = vld [vmem:[#allocation6 + $0xc0] sm:$0xf]  ;;  %v2936_v12 = vor.u32 %v3715_v10, %v2935_v9  ;;  %v3615_v13 = vld [vmem:[#allocation6 + $0xcc] sm:$0xf0]  ;;  %1693 = vmatpush.bf16.msra.mxu1 %v2680_v7 }
  0x19   :  { %v2663_v14 = vld [vmem:[#allocation6 + $0x1c0] sm:$0xf]  ;;  %v3647_v15 = vld [vmem:[#allocation6 + $0x1cc] sm:$0xf0]  ;;  %1706 = vmatpush.bf16.msra.mxu2 %v2808_v8  ;;  %v2536_v16 = vor.u32 %v3615_v13, %v2535_v11 }
  0x1a   :  { %v2664_v17 = vor.u32 %v3647_v15, %v2663_v14  ;;  %v2791_v18 = vld [vmem:[#allocation6 + $0x2c0] sm:$0xf]  ;;  %v3679_v19 = vld [vmem:[#allocation6 + $0x2cc] sm:$0xf0]  ;;  %1719 = vmatpush.bf16.msra.mxu3 %v2936_v12 }
  0x1b   :  { %v2919_v20 = vld [vmem:[#allocation6 + $0x3c0] sm:$0xf]  ;;  %v2792_v21 = vor.u32 %v3679_v19, %v2791_v18  ;;  %v3711_v22 = vld [vmem:[#allocation6 + $0x3cc] sm:$0xf0]  ;;  %1681 = vmatpush.bf16.msra.mxu0 %v2536_v16 }
  0x1c   :  { %v2519_v23 = vld [vmem:[#allocation6 + $0xa0] sm:$0xf]  ;;  %v3611_v24 = vld [vmem:[#allocation6 + $0xac] sm:$0xf0]  ;;  %v2920_v25 = vor.u32 %v3711_v22, %v2919_v20  ;;  %1694 = vmatpush.bf16.msra.mxu1 %v2664_v17 }
  0x1d   :  { %v2647_v26 = vld [vmem:[#allocation6 + $0x1a0] sm:$0xf]  ;;  %v3643_v27 = vld [vmem:[#allocation6 + $0x1ac] sm:$0xf0]  ;;  %v2520_v29 = vor.u32 %v3611_v24, %v2519_v23  ;;  %1707 = vmatpush.bf16.msra.mxu2 %v2792_v21 }
  0x1e   :  { %v2775_v28 = vld [vmem:[#allocation6 + $0x2a0] sm:$0xf]  ;;  %v3675_v30 = vld [vmem:[#allocation6 + $0x2ac] sm:$0xf0]  ;;  %v2648_v33 = vor.u32 %v3643_v27, %v2647_v26  ;;  %1720 = vmatpush.bf16.msra.mxu3 %v2920_v25 }
  0x1f   :  { %v2903_v31 = vld [vmem:[#allocation6 + $0x3a0] sm:$0xf]  ;;  %v3707_v32 = vld [vmem:[#allocation6 + $0x3ac] sm:$0xf0]  ;;  %v2776_v34 = vor.u32 %v3675_v30, %v2775_v28  ;;  %1682 = vmatpush.bf16.msra.mxu0 %v2520_v29 }
  0x20   :  { %v2503_v35 = vld [vmem:[#allocation6 + $0x80] sm:$0xf]  ;;  %v3607_v36 = vld [vmem:[#allocation6 + $0x8c] sm:$0xf0]  ;;  %v2904_v38 = vor.u32 %v3707_v32, %v2903_v31  ;;  %1695 = vmatpush.bf16.msra.mxu1 %v2648_v33 }
  0x21   :  { %v2631_v37 = vld [vmem:[#allocation6 + $0x180] sm:$0xf]  ;;  %v3639_v39 = vld [vmem:[#allocation6 + $0x18c] sm:$0xf0]  ;;  %v2504_v44 = vor.u32 %v3607_v36, %v2503_v35  ;;  %1708 = vmatpush.bf16.msra.mxu2 %v2776_v34 }
  0x22   :  { %v2759_v40 = vld [vmem:[#allocation6 + $0x280] sm:$0xf]  ;;  %v3671_v41 = vld [vmem:[#allocation6 + $0x28c] sm:$0xf0]  ;;  %v2632_v45 = vor.u32 %v3639_v39, %v2631_v37  ;;  %1721 = vmatpush.bf16.msra.mxu3 %v2904_v38 }
  0x23   :  { %v2887_v42 = vld [vmem:[#allocation6 + $0x380] sm:$0xf]  ;;  %v3703_v43 = vld [vmem:[#allocation6 + $0x38c] sm:$0xf0]  ;;  %v2760_v46 = vor.u32 %v3671_v41, %v2759_v40  ;;  %1683 = vmatpush.bf16.msra.mxu0 %v2504_v44 }
  0x24   :  { %v2487_v47 = vld [vmem:[#allocation6 + $0x60] sm:$0xf]  ;;  %v3603_v48 = vld [vmem:[#allocation6 + $0x6c] sm:$0xf0]  ;;  %v2888_v50 = vor.u32 %v3703_v43, %v2887_v42  ;;  %1696 = vmatpush.bf16.msra.mxu1 %v2632_v45 }
  0x25   :  { %v2615_v49 = vld [vmem:[#allocation6 + $0x160] sm:$0xf]  ;;  %v3635_v51 = vld [vmem:[#allocation6 + $0x16c] sm:$0xf0]  ;;  %v2488_v56 = vor.u32 %v3603_v48, %v2487_v47  ;;  %1709 = vmatpush.bf16.msra.mxu2 %v2760_v46 }
  0x26   :  { %v2743_v52 = vld [vmem:[#allocation6 + $0x260] sm:$0xf]  ;;  %v3667_v53 = vld [vmem:[#allocation6 + $0x26c] sm:$0xf0]  ;;  %v2616_v57 = vor.u32 %v3635_v51, %v2615_v49  ;;  %1722 = vmatpush.bf16.msra.mxu3 %v2888_v50 }
  0x27   :  { %v2871_v54 = vld [vmem:[#allocation6 + $0x360] sm:$0xf]  ;;  %v3699_v55 = vld [vmem:[#allocation6 + $0x36c] sm:$0xf0]  ;;  %v2744_v58 = vor.u32 %v3667_v53, %v2743_v52  ;;  %1684 = vmatpush.bf16.msra.mxu0 %v2488_v56 }
  0x28   :  { %v2471_v59 = vld [vmem:[#allocation6 + $0x40] sm:$0xf]  ;;  %v3599_v60 = vld [vmem:[#allocation6 + $0x4c] sm:$0xf0]  ;;  %v2872_v62 = vor.u32 %v3699_v55, %v2871_v54  ;;  %1697 = vmatpush.bf16.msra.mxu1 %v2616_v57 }
  0x29   :  { %v2599_v61 = vld [vmem:[#allocation6 + $0x140] sm:$0xf]  ;;  %v3631_v63 = vld [vmem:[#allocation6 + $0x14c] sm:$0xf0]  ;;  %v2472_v4 = vor.u32 %v3599_v60, %v2471_v59  ;;  %1710 = vmatpush.bf16.msra.mxu2 %v2744_v58 }
  0x2a   :  { %v2727_v0 = vld [vmem:[#allocation6 + $0x240] sm:$0xf]  ;;  %v3663_v1 = vld [vmem:[#allocation6 + $0x24c] sm:$0xf0]  ;;  %v2600_v5 = vor.u32 %v3631_v63, %v2599_v61  ;;  %1723 = vmatpush.bf16.msra.mxu3 %v2872_v62 }
  0x2b   :  { %v2855_v2 = vld [vmem:[#allocation6 + $0x340] sm:$0xf]  ;;  %v3695_v3 = vld [vmem:[#allocation6 + $0x34c] sm:$0xf0]  ;;  %v2728_v6 = vor.u32 %v3663_v1, %v2727_v0  ;;  %1685 = vmatpush.bf16.msra.mxu0 %v2472_v4 }
  0x2c   :  { %v2455_v7 = vld [vmem:[#allocation6 + $0x20] sm:$0xf]  ;;  %v3595_v8 = vld [vmem:[#allocation6 + $0x2c] sm:$0xf0]  ;;  %v2856_v10 = vor.u32 %v3695_v3, %v2855_v2  ;;  %1698 = vmatpush.bf16.msra.mxu1 %v2600_v5  ;;  %v86_v5 = vld [vmem:[#allocation3 + $0x18] sm:$0xff] }
  0x2d   :  { %v2583_v9 = vld [vmem:[#allocation6 + $0x120] sm:$0xf]  ;;  %v3627_v11 = vld [vmem:[#allocation6 + $0x12c] sm:$0xf0]  ;;  %v2456_v16 = vor.u32 %v3595_v8, %v2455_v7  ;;  %1711 = vmatpush.bf16.msra.mxu2 %v2728_v6 }
  0x2e   :  { %v2711_v12 = vld [vmem:[#allocation6 + $0x220] sm:$0xf]  ;;  %v3659_v13 = vld [vmem:[#allocation6 + $0x22c] sm:$0xf0]  ;;  %v2584_v19 = vor.u32 %v3627_v11, %v2583_v9  ;;  %1724 = vmatpush.bf16.msra.mxu3 %v2856_v10  ;;  %v84_v11 = vld [vmem:[#allocation3 + $0x8] sm:$0xff] }
  0x2f   :  { %v2839_v14 = vld [vmem:[#allocation6 + $0x320] sm:$0xf]  ;;  %v3691_v15 = vld [vmem:[#allocation6 + $0x32c] sm:$0xf0]  ;;  %v2712_v20 = vor.u32 %v3659_v13, %v2711_v12  ;;  %1686 = vmatpush.bf16.msra.mxu0 %v2456_v16  ;;  %v4024_v12 = vmov 0  }
  0x30   :  { %v2439_v17 = vld [vmem:[#allocation6] sm:$0xf]  ;;  %v3591_v18 = vld [vmem:[#allocation6 + $0xc] sm:$0xf0]  ;;  %v2840_v24 = vor.u32 %v3691_v15, %v2839_v14  ;;  %1699 = vmatpush.bf16.msra.mxu1 %v2584_v19  ;;  %82 = vst.msk [vmem:[#allocation2 + $0x1c] sm:$0xf] %vm81_vm0, %v4024_v12 }
  0x31   :  { %v2567_v21 = vld [vmem:[#allocation6 + $0x100] sm:$0xf]  ;;  %v3623_v22 = vld [vmem:[#allocation6 + $0x10c] sm:$0xf0]  ;;  %v2440_v31 = vor.u32 %v3591_v18, %v2439_v17  ;;  %1712 = vmatpush.bf16.msra.mxu2 %v2712_v20 }
  0x32   :  { %v2695_v23 = vld [vmem:[#allocation6 + $0x200] sm:$0xf]  ;;  %v3655_v25 = vld [vmem:[#allocation6 + $0x20c] sm:$0xf0]  ;;  %v2568_v35 = vor.u32 %v3623_v22, %v2567_v21  ;;  %1725 = vmatpush.bf16.msra.mxu3 %v2840_v24 }
  0x33   :  { %v2823_v26 = vld [vmem:[#allocation6 + $0x300] sm:$0xf]  ;;  %v3687_v27 = vld [vmem:[#allocation6 + $0x30c] sm:$0xf0]  ;;  %v2696_v36 = vor.u32 %v3655_v25, %v2695_v23  ;;  %1687 = vmatpush.bf16.msra.mxu0 %v2440_v31 }
  0x34   :  { %v3063_v28 = vld [vmem:[#allocation6 + $0x4e0] sm:$0xf]  ;;  %v3747_v29 = vld [vmem:[#allocation6 + $0x4ec] sm:$0xf0]  ;;  %v2824_v39 = vor.u32 %v3687_v27, %v2823_v26  ;;  %1700 = vmatpush.bf16.msra.mxu1 %v2568_v35 }
  0x35   :  { %v3191_v30 = vld [vmem:[#allocation6 + $0x5e0] sm:$0xf]  ;;  %v3779_v32 = vld [vmem:[#allocation6 + $0x5ec] sm:$0xf0]  ;;  %v3064_v40 = vor.u32 %v3747_v29, %v3063_v28  ;;  %1713 = vmatpush.bf16.msra.mxu2 %v2696_v36 }
  0x36   :  { %v3319_v33 = vld [vmem:[#allocation6 + $0x6e0] sm:$0xf]  ;;  %v3811_v34 = vld [vmem:[#allocation6 + $0x6ec] sm:$0xf0]  ;;  %v3192_v41 = vor.u32 %v3779_v32, %v3191_v30  ;;  %1726 = vmatpush.bf16.msra.mxu3 %v2824_v39 }
  0x37   :  { %v3447_v37 = vld [vmem:[#allocation6 + $0x7e0] sm:$0xf]  ;;  %v3843_v38 = vld [vmem:[#allocation6 + $0x7ec] sm:$0xf0]  ;;  %v3320_v42 = vor.u32 %v3811_v34, %v3319_v33  ;;  %1732 = vmatpush.bf16.msrb.mxu0 %v3064_v40 }
  0x38   :  { %v3047_v43 = vld [vmem:[#allocation6 + $0x4c0] sm:$0xf]  ;;  %v3743_v44 = vld [vmem:[#allocation6 + $0x4cc] sm:$0xf0]  ;;  %v3448_v46 = vor.u32 %v3843_v38, %v3447_v37  ;;  %1745 = vmatpush.bf16.msrb.mxu1 %v3192_v41  ;;  %v90_v41 = vld [vmem:[#allocation3 + $0x38] sm:$0xff] }
  0x39   :  { %v3175_v45 = vld [vmem:[#allocation6 + $0x5c0] sm:$0xf]  ;;  %v3775_v47 = vld [vmem:[#allocation6 + $0x5cc] sm:$0xf0]  ;;  %v3048_v52 = vor.u32 %v3743_v44, %v3047_v43  ;;  %1758 = vmatpush.bf16.msrb.mxu2 %v3320_v42 }
  0x3a   :  { %v3303_v48 = vld [vmem:[#allocation6 + $0x6c0] sm:$0xf]  ;;  %v3807_v49 = vld [vmem:[#allocation6 + $0x6cc] sm:$0xf0]  ;;  %v3176_v54 = vor.u32 %v3775_v47, %v3175_v45  ;;  %1771 = vmatpush.bf16.msrb.mxu3 %v3448_v46 }
  0x3b   :  { %v3431_v50 = vld [vmem:[#allocation6 + $0x7c0] sm:$0xf]  ;;  %v3839_v51 = vld [vmem:[#allocation6 + $0x7cc] sm:$0xf0]  ;;  %v3304_v55 = vor.u32 %v3807_v49, %v3303_v48  ;;  %1733 = vmatpush.bf16.msrb.mxu0 %v3048_v52 }
  0x3c   :  { %v3031_v53 = vld [vmem:[#allocation6 + $0x4a0] sm:$0xf]  ;;  %v3739_v56 = vld [vmem:[#allocation6 + $0x4ac] sm:$0xf0]  ;;  %v3432_v59 = vor.u32 %v3839_v51, %v3431_v50  ;;  %1746 = vmatpush.bf16.msrb.mxu1 %v3176_v54 }
  0x3d   :  { %v3159_v57 = vld [vmem:[#allocation6 + $0x5a0] sm:$0xf]  ;;  %v3771_v58 = vld [vmem:[#allocation6 + $0x5ac] sm:$0xf0]  ;;  %v3032_v2 = vor.u32 %v3739_v56, %v3031_v53  ;;  %1759 = vmatpush.bf16.msrb.mxu2 %v3304_v55 }
  0x3e   :  { %v3287_v60 = vld [vmem:[#allocation6 + $0x6a0] sm:$0xf]  ;;  %v3803_v61 = vld [vmem:[#allocation6 + $0x6ac] sm:$0xf0]  ;;  %v3160_v6 = vor.u32 %v3771_v58, %v3159_v57  ;;  %1772 = vmatpush.bf16.msrb.mxu3 %v3432_v59 }
  0x3f   :  { %v3415_v62 = vld [vmem:[#allocation6 + $0x7a0] sm:$0xf]  ;;  %v3835_v63 = vld [vmem:[#allocation6 + $0x7ac] sm:$0xf0]  ;;  %v3288_v7 = vor.u32 %v3803_v61, %v3287_v60  ;;  %1734 = vmatpush.bf16.msrb.mxu0 %v3032_v2 }
  0x40   :  { %v3015_v0 = vld [vmem:[#allocation6 + $0x480] sm:$0xf]  ;;  %v3735_v1 = vld [vmem:[#allocation6 + $0x48c] sm:$0xf0]  ;;  %v3416_v13 = vor.u32 %v3835_v63, %v3415_v62  ;;  %1747 = vmatpush.bf16.msrb.mxu1 %v3160_v6 }
  0x41   :  { %v3143_v3 = vld [vmem:[#allocation6 + $0x580] sm:$0xf]  ;;  %v85_v4 = vld [vmem:[#allocation3 + $0x10] sm:$0xff]  ;;  %v3016_v21 = vor.u32 %v3735_v1, %v3015_v0  ;;  %1760 = vmatpush.bf16.msrb.mxu2 %v3288_v7  ;;  %v88_v7 = vld [vmem:[#allocation3 + $0x28] sm:$0xff] }
  0x42   :  { %v3767_v8 = vld [vmem:[#allocation6 + $0x58c] sm:$0xf0]  ;;  %v92_v9 = vpack.c.bf16 %v86_v5, %v85_v4  ;;  %v83_v10 = vld [vmem:[#allocation3] sm:$0xff]  ;;  %1773 = vmatpush.bf16.msrb.mxu3 %v3416_v13 }
  0x43   :  { %v3271_v14 = vld [vmem:[#allocation6 + $0x680] sm:$0xf]  ;;  %v3799_v15 = vld [vmem:[#allocation6 + $0x68c] sm:$0xf0]  ;;  %v91_v16 = vpack.c.bf16 %v84_v11, %v83_v10  ;;  %v3144_v22 = vor.u32 %v3767_v8, %v3143_v3  ;;  %1735 = vmatpush.bf16.msrb.mxu0 %v3016_v21  ;;  %v2681_v21 = vld [vmem:[#allocation6 + $0x1f0] sm:$0xf0] }
  0x44   :  { %v3399_v17 = vld [vmem:[#allocation6 + $0x780] sm:$0xf]  ;;  %v3831_v18 = vld [vmem:[#allocation6 + $0x78c] sm:$0xf0]  ;;  %v378_v19 = vunpack.c.l.b16 %v92_v9  ;;  %v379_v20 = vunpack.c.h.b16 %v92_v9  ;;  %v3272_v25 = vor.u32 %v3799_v15, %v3271_v14 }
  0x45   :  { %v376_v23 = vunpack.c.l.b16 %v91_v16  ;;  %v377_v24 = vunpack.c.h.b16 %v91_v16  ;;  %v2999_v26 = vld [vmem:[#allocation6 + $0x460] sm:$0xf]  ;;  %v3731_v27 = vld [vmem:[#allocation6 + $0x46c] sm:$0xf0]  ;;  %v3400_v31 = vor.u32 %v3831_v18, %v3399_v17  ;;  %1748 = vmatpush.bf16.msrb.mxu1 %v3144_v22  ;;  %v3617_v17 = vld [vmem:[#allocation6 + $0xe4] sm:$0xf] }
  0x46   :  { %v3127_v28 = vld [vmem:[#allocation6 + $0x560] sm:$0xf]  ;;  %v4068_v29 = vpack.c.b16 %v378_v19, %v378_v19  ;;  %v4070_v30 = vpack.c.b16 %v379_v20, %v379_v20  ;;  %v3763_v32 = vld [vmem:[#allocation6 + $0x56c] sm:$0xf0]  ;;  %v3000_v39 = vor.u32 %v3731_v27, %v2999_v26  ;;  %1761 = vmatpush.bf16.msrb.mxu2 %v3272_v25  ;;  %v2553_v18 = vld [vmem:[#allocation6 + $0xf0] sm:$0xf0] }
  0x47   :  { %v3255_v33 = vld [vmem:[#allocation6 + $0x660] sm:$0xf]  ;;  %v3795_v34 = vld [vmem:[#allocation6 + $0x66c] sm:$0xf0]  ;;  %v4072_v35 = vpack.c.b16 %v376_v23, %v376_v23  ;;  %v4074_v36 = vpack.c.b16 %v377_v24, %v377_v24  ;;  %v3128_v42 = vor.u32 %v3763_v32, %v3127_v28  ;;  %1774 = vmatpush.bf16.msrb.mxu3 %v3400_v31  ;;  %v3649_v19 = vld [vmem:[#allocation6 + $0x1e4] sm:$0xf]  ;;  %v2556_v32 = vor.u32 %v3617_v17, %v2553_v18 }
  0x48   :  { %v3383_v37 = vld [vmem:[#allocation6 + $0x760] sm:$0xf]  ;;  %v3827_v38 = vld [vmem:[#allocation6 + $0x76c] sm:$0xf0]  ;;  %1714 = vmatmul.bf16.vlgmr.msra.gmra.mxu2 %v4068_v29  ;;  %1727 = vmatmul.bf16.vlgmr.msra.gmra.mxu3 %v4070_v30  ;;  %v3256_v43 = vor.u32 %v3795_v34, %v3255_v33  ;;  %v3681_v22 = vld [vmem:[#allocation6 + $0x2e4] sm:$0xf] }
  0x49   :  { %1701 = vmatmul.bf16.vlgmr.msra.gmra.mxu1 %v4074_v36  ;;  %v89_v40 = vld [vmem:[#allocation3 + $0x30] sm:$0xff]  ;;  %v2983_v44 = vld [vmem:[#allocation6 + $0x440] sm:$0xf]  ;;  %v3384_v47 = vor.u32 %v3827_v38, %v3383_v37  ;;  %1688 = vmatmul.bf16.vlgmr.msra.gmra.mxu0 %v4072_v35  ;;  %v3713_v26 = vld [vmem:[#allocation6 + $0x3e4] sm:$0xf]  ;;  %v2684_v37 = vor.u32 %v3649_v19, %v2681_v21 }
  0x4a   :  { %v3727_v45 = vld [vmem:[#allocation6 + $0x44c] sm:$0xf0]  ;;  %v3111_v46 = vld [vmem:[#allocation6 + $0x540] sm:$0xf]  ;;  %v94_v53 = vpack.c.bf16 %v90_v41, %v89_v40  ;;  %1736 = vmatpush.bf16.msrb.mxu0 %v3000_v39  ;;  %1749 = vmatpush.bf16.msrb.mxu1 %v3128_v42  ;;  %v2809_v23 = vld [vmem:[#allocation6 + $0x2f0] sm:$0xf0] }
  0x4b   :  { %v3759_v48 = vld [vmem:[#allocation6 + $0x54c] sm:$0xf0]  ;;  %v3239_v49 = vld [vmem:[#allocation6 + $0x640] sm:$0xf]  ;;  %v2984_v54 = vor.u32 %v3727_v45, %v2983_v44  ;;  %1762 = vmatpush.bf16.msrb.mxu2 %v3256_v43  ;;  %1775 = vmatpush.bf16.msrb.mxu3 %v3384_v47  ;;  %v2937_v27 = vld [vmem:[#allocation6 + $0x3f0] sm:$0xf0]  ;;  %v2812_v38 = vor.u32 %v3681_v22, %v2809_v23 }
  0x4c   :  { %v3791_v50 = vld [vmem:[#allocation6 + $0x64c] sm:$0xf0]  ;;  %v3367_v51 = vld [vmem:[#allocation6 + $0x740] sm:$0xf]  ;;  %v3112_v58 = vor.u32 %v3759_v48, %v3111_v46  ;;  %101 = vst.msk [vmem:[#allocation2 + $0x18] sm:$0xff] %vm100_vm3, %v94_v53  ;;  %v2940_v44 = vor.u32 %v3713_v26, %v2937_v27 }
  0x4d   :  { %v3823_v52 = vld [vmem:[#allocation6 + $0x74c] sm:$0xf0]  ;;  %v2967_v55 = vld [vmem:[#allocation6 + $0x420] sm:$0xf]  ;;  %v3240_v59 = vor.u32 %v3791_v50, %v3239_v49  ;;  %v3613_v39 = vld [vmem:[#allocation6 + $0xc4] sm:$0xf] }
  0x4e   :  { %v3723_v56 = vld [vmem:[#allocation6 + $0x42c] sm:$0xf0]  ;;  %v3095_v57 = vld [vmem:[#allocation6 + $0x520] sm:$0xf]  ;;  %v3368_v62 = vor.u32 %v3823_v52, %v3367_v51  ;;  %1737 = vmatpush.bf16.msrb.mxu0 %v2984_v54  ;;  %1750 = vmatpush.bf16.msrb.mxu1 %v3112_v58  ;;  %v2537_v40 = vld [vmem:[#allocation6 + $0xd0] sm:$0xf0] }
  0x4f   :  { %v3755_v60 = vld [vmem:[#allocation6 + $0x52c] sm:$0xf0]  ;;  %v3223_v61 = vld [vmem:[#allocation6 + $0x620] sm:$0xf]  ;;  %v2968_v4 = vor.u32 %v3723_v56, %v2967_v55  ;;  %1763 = vmatpush.bf16.msrb.mxu2 %v3240_v59  ;;  %v3645_v41 = vld [vmem:[#allocation6 + $0x1c4] sm:$0xf]  ;;  %v2540_v53 = vor.u32 %v3613_v39, %v2537_v40 }
  0x50   :  { %v3787_v63 = vld [vmem:[#allocation6 + $0x62c] sm:$0xf0]  ;;  %v3351_v0 = vld [vmem:[#allocation6 + $0x720] sm:$0xf]  ;;  %v3096_v8 = vor.u32 %v3755_v60, %v3095_v57  ;;  %1776 = vmatpush.bf16.msrb.mxu3 %v3368_v62  ;;  %v2665_v45 = vld [vmem:[#allocation6 + $0x1d0] sm:$0xf0] }
  0x51   :  { %v3819_v1 = vld [vmem:[#allocation6 + $0x72c] sm:$0xf0]  ;;  %v2951_v2 = vld [vmem:[#allocation6 + $0x400] sm:$0xf]  ;;  %v3224_v9 = vor.u32 %v3787_v63, %v3223_v61  ;;  %v3677_v46 = vld [vmem:[#allocation6 + $0x2c4] sm:$0xf]  ;;  %v2668_v55 = vor.u32 %v3645_v41, %v2665_v45 }
  0x52   :  { %v87_v3 = vld [vmem:[#allocation3 + $0x20] sm:$0xff]  ;;  %v3719_v5 = vld [vmem:[#allocation6 + $0x40c] sm:$0xf0]  ;;  %v3352_v14 = vor.u32 %v3819_v1, %v3351_v0  ;;  %1738 = vmatpush.bf16.msrb.mxu0 %v2968_v4  ;;  %1751 = vmatpush.bf16.msrb.mxu1 %v3096_v8  ;;  %v2793_v47 = vld [vmem:[#allocation6 + $0x2d0] sm:$0xf0] }
  0x53   :  { %v3079_v6 = vld [vmem:[#allocation6 + $0x500] sm:$0xf]  ;;  %v3751_v10 = vld [vmem:[#allocation6 + $0x50c] sm:$0xf0]  ;;  %v93_v13 = vpack.c.bf16 %v88_v7, %v87_v3  ;;  %v2952_v20 = vor.u32 %v3719_v5, %v2951_v2  ;;  %1764 = vmatpush.bf16.msrb.mxu2 %v3224_v9  ;;  %v105_v33 = vld [vmem:[#allocation2 + $0x18] sm:$0xff]  ;;  %v2796_v56 = vor.u32 %v3677_v46, %v2793_v47 }
  0x54   :  { %v3207_v11 = vld [vmem:[#allocation6 + $0x600] sm:$0xf]  ;;  %v3783_v12 = vld [vmem:[#allocation6 + $0x60c] sm:$0xf0]  ;;  %v3080_v24 = vor.u32 %v3751_v10, %v3079_v6  ;;  %1777 = vmatpush.bf16.msrb.mxu3 %v3352_v14  ;;  %v382_v42 = vunpack.c.l.b16 %v105_v33  ;;  %v383_v43 = vunpack.c.h.b16 %v105_v33  ;;  %v3709_v48 = vld [vmem:[#allocation6 + $0x3c4] sm:$0xf] }
  0x55   :  { %v3335_v15 = vld [vmem:[#allocation6 + $0x700] sm:$0xf]  ;;  %v3815_v16 = vld [vmem:[#allocation6 + $0x70c] sm:$0xf0]  ;;  %v3208_v25 = vor.u32 %v3783_v12, %v3207_v11  ;;  %v380_v28 = vunpack.c.l.b16 %v93_v13  ;;  %v381_v34 = vunpack.c.h.b16 %v93_v13  ;;  %v2921_v49 = vld [vmem:[#allocation6 + $0x3d0] sm:$0xf0] }
  0x56   :  { %v3336_v31 = vor.u32 %v3815_v16, %v3335_v15  ;;  %1739 = vmatpush.bf16.msrb.mxu0 %v2952_v20  ;;  %1752 = vmatpush.bf16.msrb.mxu1 %v3080_v24  ;;  %v4080_v50 = vpack.c.b16 %v382_v42, %v382_v42  ;;  %v4084_v52 = vpack.c.b16 %v383_v43, %v383_v43  ;;  %v3609_v57 = vld [vmem:[#allocation6 + $0xa4] sm:$0xf]  ;;  %v2521_v58 = vld [vmem:[#allocation6 + $0xb0] sm:$0xf0] }
  0x57   :  { %1765 = vmatpush.bf16.msrb.mxu2 %v3208_v25  ;;  %v4082_v51 = vpack.c.b16 %v380_v28, %v380_v28  ;;  %v4086_v54 = vpack.c.b16 %v381_v34, %v381_v34  ;;  %v3641_v59 = vld [vmem:[#allocation6 + $0x1a4] sm:$0xf]  ;;  %v2924_v60 = vor.u32 %v3709_v48, %v2921_v49  ;;  %v2649_v61 = vld [vmem:[#allocation6 + $0x1b0] sm:$0xf0]  ;;  %v2524_v2 = vor.u32 %v3609_v57, %v2521_v58 }
  0x58   :  { %1778 = vmatpush.bf16.msrb.mxu3 %v3336_v31  ;;  %v3673_v62 = vld [vmem:[#allocation6 + $0x2a4] sm:$0xf]  ;;  %v2777_v63 = vld [vmem:[#allocation6 + $0x2b0] sm:$0xf0]  ;;  %v2652_v3 = vor.u32 %v3641_v59, %v2649_v61 }
  0x59   :  { %v3705_v0 = vld [vmem:[#allocation6 + $0x3a4] sm:$0xf]  ;;  %v2905_v1 = vld [vmem:[#allocation6 + $0x3b0] sm:$0xf0]  ;;  %1740 = vmatmul.bf16.vlgmr.msrb.gmra.mxu0 %v4082_v51  ;;  %1753 = vmatmul.bf16.vlgmr.msrb.gmra.mxu1 %v4086_v54  ;;  %v2780_v4 = vor.u32 %v3673_v62, %v2777_v63 }
  0x5a   :  { %1784 = vmatpush.bf16.msra.mxu0 %v2556_v32  ;;  %1797 = vmatpush.bf16.msra.mxu1 %v2684_v37  ;;  %v3605_v5 = vld [vmem:[#allocation6 + $0x84] sm:$0xf]  ;;  %v2505_v6 = vld [vmem:[#allocation6 + $0x90] sm:$0xf0]  ;;  %v2908_v8 = vor.u32 %v3705_v0, %v2905_v1 }
  0x5b   :  { %1810 = vmatpush.bf16.msra.mxu2 %v2812_v38  ;;  %1779 = vmatmul.bf16.vlgmr.msrb.gmra.mxu3 %v4084_v52  ;;  %v3637_v7 = vld [vmem:[#allocation6 + $0x184] sm:$0xf]  ;;  %v2633_v9 = vld [vmem:[#allocation6 + $0x190] sm:$0xf0]  ;;  %v2508_v14 = vor.u32 %v3605_v5, %v2505_v6 }
  0x5c   :  { %1823 = vmatpush.bf16.msra.mxu3 %v2940_v44  ;;  %1766 = vmatmul.bf16.vlgmr.msrb.gmra.mxu2 %v4080_v50  ;;  %v3669_v10 = vld [vmem:[#allocation6 + $0x284] sm:$0xf]  ;;  %v2761_v11 = vld [vmem:[#allocation6 + $0x290] sm:$0xf0]  ;;  %v2636_v15 = vor.u32 %v3637_v7, %v2633_v9 }
  0x5d   :  { %v3701_v12 = vld [vmem:[#allocation6 + $0x384] sm:$0xf]  ;;  %v2889_v13 = vld [vmem:[#allocation6 + $0x390] sm:$0xf0]  ;;  %v2764_v16 = vor.u32 %v3669_v10, %v2761_v11 }
  0x5e   :  { %1785 = vmatpush.bf16.msra.mxu0 %v2540_v53  ;;  %1798 = vmatpush.bf16.msra.mxu1 %v2668_v55  ;;  %v3601_v17 = vld [vmem:[#allocation6 + $0x64] sm:$0xf]  ;;  %v2489_v18 = vld [vmem:[#allocation6 + $0x70] sm:$0xf0]  ;;  %v2892_v20 = vor.u32 %v3701_v12, %v2889_v13 }
  0x5f   :  { %1811 = vmatpush.bf16.msra.mxu2 %v2796_v56  ;;  %v3633_v19 = vld [vmem:[#allocation6 + $0x164] sm:$0xf]  ;;  %v2617_v21 = vld [vmem:[#allocation6 + $0x170] sm:$0xf0]  ;;  %v2492_v26 = vor.u32 %v3601_v17, %v2489_v18 }
  0x60   :  { %1824 = vmatpush.bf16.msra.mxu3 %v2924_v60  ;;  %v3665_v22 = vld [vmem:[#allocation6 + $0x264] sm:$0xf]  ;;  %v2745_v23 = vld [vmem:[#allocation6 + $0x270] sm:$0xf0]  ;;  %v2620_v27 = vor.u32 %v3633_v19, %v2617_v21 }
  0x61   :  { %v3697_v24 = vld [vmem:[#allocation6 + $0x364] sm:$0xf]  ;;  %v2873_v25 = vld [vmem:[#allocation6 + $0x370] sm:$0xf0]  ;;  %v2748_v28 = vor.u32 %v3665_v22, %v2745_v23 }
  0x62   :  { %1786 = vmatpush.bf16.msra.mxu0 %v2524_v2  ;;  %1799 = vmatpush.bf16.msra.mxu1 %v2652_v3  ;;  %v3597_v31 = vld [vmem:[#allocation6 + $0x44] sm:$0xf]  ;;  %v2473_v32 = vld [vmem:[#allocation6 + $0x50] sm:$0xf0]  ;;  %v2876_v34 = vor.u32 %v3697_v24, %v2873_v25 }
  0x63   :  { %1812 = vmatpush.bf16.msra.mxu2 %v2780_v4  ;;  %v3629_v33 = vld [vmem:[#allocation6 + $0x144] sm:$0xf]  ;;  %v2601_v37 = vld [vmem:[#allocation6 + $0x150] sm:$0xf0]  ;;  %v2476_v42 = vor.u32 %v3597_v31, %v2473_v32 }
  0x64   :  { %1825 = vmatpush.bf16.msra.mxu3 %v2908_v8  ;;  %v3661_v38 = vld [vmem:[#allocation6 + $0x244] sm:$0xf]  ;;  %v2729_v39 = vld [vmem:[#allocation6 + $0x250] sm:$0xf0]  ;;  %v2604_v43 = vor.u32 %v3629_v33, %v2601_v37 }
  0x65   :  { %v3693_v40 = vld [vmem:[#allocation6 + $0x344] sm:$0xf]  ;;  %v2857_v41 = vld [vmem:[#allocation6 + $0x350] sm:$0xf0]  ;;  %v2732_v44 = vor.u32 %v3661_v38, %v2729_v39 }
  0x66   :  { %1787 = vmatpush.bf16.msra.mxu0 %v2508_v14  ;;  %1800 = vmatpush.bf16.msra.mxu1 %v2636_v15  ;;  %v3593_v45 = vld [vmem:[#allocation6 + $0x24] sm:$0xf]  ;;  %v2457_v46 = vld [vmem:[#allocation6 + $0x30] sm:$0xf0]  ;;  %v2860_v48 = vor.u32 %v3693_v40, %v2857_v41 }
  0x67   :  { %1813 = vmatpush.bf16.msra.mxu2 %v2764_v16  ;;  %v3625_v47 = vld [vmem:[#allocation6 + $0x124] sm:$0xf]  ;;  %v2585_v49 = vld [vmem:[#allocation6 + $0x130] sm:$0xf0]  ;;  %v2460_v58 = vor.u32 %v3593_v45, %v2457_v46 }
  0x68   :  { %1826 = vmatpush.bf16.msra.mxu3 %v2892_v20  ;;  %v3657_v53 = vld [vmem:[#allocation6 + $0x224] sm:$0xf]  ;;  %v2713_v55 = vld [vmem:[#allocation6 + $0x230] sm:$0xf0]  ;;  %v2588_v62 = vor.u32 %v3625_v47, %v2585_v49 }
  0x69   :  { %v3689_v56 = vld [vmem:[#allocation6 + $0x324] sm:$0xf]  ;;  %v2841_v57 = vld [vmem:[#allocation6 + $0x330] sm:$0xf0]  ;;  %v2716_v63 = vor.u32 %v3657_v53, %v2713_v55 }
  0x6a   :  { %1788 = vmatpush.bf16.msra.mxu0 %v2492_v26  ;;  %1801 = vmatpush.bf16.msra.mxu1 %v2620_v27  ;;  %v3589_v59 = vld [vmem:[#allocation6 + $0x4] sm:$0xf]  ;;  %v2441_v60 = vld [vmem:[#allocation6 + $0x10] sm:$0xf0]  ;;  %v2844_v3 = vor.u32 %v3689_v56, %v2841_v57 }
  0x6b   :  { %1814 = vmatpush.bf16.msra.mxu2 %v2748_v28  ;;  %v3621_v61 = vld [vmem:[#allocation6 + $0x104] sm:$0xf]  ;;  %v2569_v0 = vld [vmem:[#allocation6 + $0x110] sm:$0xf0]  ;;  %v2444_v9 = vor.u32 %v3589_v59, %v2441_v60 }
  0x6c   :  { %1827 = vmatpush.bf16.msra.mxu3 %v2876_v34  ;;  %v3653_v1 = vld [vmem:[#allocation6 + $0x204] sm:$0xf]  ;;  %v2697_v2 = vld [vmem:[#allocation6 + $0x210] sm:$0xf0]  ;;  %v2572_v13 = vor.u32 %v3621_v61, %v2569_v0 }
  0x6d   :  { %v3685_v4 = vld [vmem:[#allocation6 + $0x304] sm:$0xf]  ;;  %v2825_v5 = vld [vmem:[#allocation6 + $0x310] sm:$0xf0]  ;;  %v2700_v14 = vor.u32 %v3653_v1, %v2697_v2 }
  0x6e   :  { %1789 = vmatpush.bf16.msra.mxu0 %v2476_v42  ;;  %1802 = vmatpush.bf16.msra.mxu1 %v2604_v43  ;;  %v3745_v6 = vld [vmem:[#allocation6 + $0x4e4] sm:$0xf]  ;;  %v3065_v7 = vld [vmem:[#allocation6 + $0x4f0] sm:$0xf0]  ;;  %v2828_v17 = vor.u32 %v3685_v4, %v2825_v5 }
  0x6f   :  { %1815 = vmatpush.bf16.msra.mxu2 %v2732_v44  ;;  %v3777_v8 = vld [vmem:[#allocation6 + $0x5e4] sm:$0xf]  ;;  %v3193_v10 = vld [vmem:[#allocation6 + $0x5f0] sm:$0xf0]  ;;  %v3068_v18 = vor.u32 %v3745_v6, %v3065_v7 }
  0x70   :  { %1828 = vmatpush.bf16.msra.mxu3 %v2860_v48  ;;  %v3809_v11 = vld [vmem:[#allocation6 + $0x6e4] sm:$0xf]  ;;  %v3321_v12 = vld [vmem:[#allocation6 + $0x6f0] sm:$0xf0]  ;;  %v3196_v19 = vor.u32 %v3777_v8, %v3193_v10 }
  0x71   :  { %v3841_v15 = vld [vmem:[#allocation6 + $0x7e4] sm:$0xf]  ;;  %v3449_v16 = vld [vmem:[#allocation6 + $0x7f0] sm:$0xf0]  ;;  %v3324_v20 = vor.u32 %v3809_v11, %v3321_v12 }
  0x72   :  { %1790 = vmatpush.bf16.msra.mxu0 %v2460_v58  ;;  %1803 = vmatpush.bf16.msra.mxu1 %v2588_v62  ;;  %v3741_v21 = vld [vmem:[#allocation6 + $0x4c4] sm:$0xf]  ;;  %v3049_v22 = vld [vmem:[#allocation6 + $0x4d0] sm:$0xf0]  ;;  %v3452_v24 = vor.u32 %v3841_v15, %v3449_v16 }
  0x73   :  { %1816 = vmatpush.bf16.msra.mxu2 %v2716_v63  ;;  %v3773_v23 = vld [vmem:[#allocation6 + $0x5c4] sm:$0xf]  ;;  %v3177_v25 = vld [vmem:[#allocation6 + $0x5d0] sm:$0xf0]  ;;  %v3052_v32 = vor.u32 %v3741_v21, %v3049_v22 }
  0x74   :  { %1829 = vmatpush.bf16.msra.mxu3 %v2844_v3  ;;  %v3805_v26 = vld [vmem:[#allocation6 + $0x6c4] sm:$0xf]  ;;  %v3305_v27 = vld [vmem:[#allocation6 + $0x6d0] sm:$0xf0]  ;;  %v3180_v33 = vor.u32 %v3773_v23, %v3177_v25 }
  0x75   :  { %v3837_v28 = vld [vmem:[#allocation6 + $0x7c4] sm:$0xf]  ;;  %v3433_v31 = vld [vmem:[#allocation6 + $0x7d0] sm:$0xf0]  ;;  %v3308_v34 = vor.u32 %v3805_v26, %v3305_v27 }
  0x76   :  { %1791 = vmatpush.bf16.msra.mxu0 %v2444_v9  ;;  %1804 = vmatpush.bf16.msra.mxu1 %v2572_v13  ;;  %v3737_v37 = vld [vmem:[#allocation6 + $0x4a4] sm:$0xf]  ;;  %v3033_v38 = vld [vmem:[#allocation6 + $0x4b0] sm:$0xf0]  ;;  %v3436_v40 = vor.u32 %v3837_v28, %v3433_v31 }
  0x77   :  { %1817 = vmatpush.bf16.msra.mxu2 %v2700_v14  ;;  %v3769_v39 = vld [vmem:[#allocation6 + $0x5a4] sm:$0xf]  ;;  %v3161_v41 = vld [vmem:[#allocation6 + $0x5b0] sm:$0xf0]  ;;  %v3036_v46 = vor.u32 %v3737_v37, %v3033_v38 }
  0x78   :  { %1830 = vmatpush.bf16.msra.mxu3 %v2828_v17  ;;  %v3801_v42 = vld [vmem:[#allocation6 + $0x6a4] sm:$0xf]  ;;  %v3289_v43 = vld [vmem:[#allocation6 + $0x6b0] sm:$0xf0]  ;;  %v3164_v47 = vor.u32 %v3769_v39, %v3161_v41 }
  0x79   :  { %v3833_v44 = vld [vmem:[#allocation6 + $0x7a4] sm:$0xf]  ;;  %v3417_v45 = vld [vmem:[#allocation6 + $0x7b0] sm:$0xf0]  ;;  %1792 = vmatmul.bf16.vlgmr.msra.gmra.mxu0 %v4072_v35  ;;  %1805 = vmatmul.bf16.vlgmr.msra.gmra.mxu1 %v4074_v36  ;;  %v3292_v48 = vor.u32 %v3801_v42, %v3289_v43 }
  0x7a   :  { %1836 = vmatpush.bf16.msrb.mxu0 %v3068_v18  ;;  %1849 = vmatpush.bf16.msrb.mxu1 %v3196_v19  ;;  %v3733_v49 = vld [vmem:[#allocation6 + $0x484] sm:$0xf]  ;;  %v3017_v53 = vld [vmem:[#allocation6 + $0x490] sm:$0xf0]  ;;  %v3420_v56 = vor.u32 %v3833_v44, %v3417_v45 }
  0x7b   :  { %1862 = vmatpush.bf16.msrb.mxu2 %v3324_v20  ;;  %1831 = vmatmul.bf16.vlgmr.msra.gmra.mxu3 %v4070_v30  ;;  %v3765_v55 = vld [vmem:[#allocation6 + $0x584] sm:$0xf]  ;;  %v3145_v57 = vld [vmem:[#allocation6 + $0x590] sm:$0xf0]  ;;  %v3020_v62 = vor.u32 %v3733_v49, %v3017_v53  ;;  %v2559_v53 = vld [vmem:[#allocation6 + $0xe8] sm:$0xf] }
  0x7c   :  { %1875 = vmatpush.bf16.msrb.mxu3 %v3452_v24  ;;  %1818 = vmatmul.bf16.vlgmr.msra.gmra.mxu2 %v4068_v29  ;;  %v3797_v58 = vld [vmem:[#allocation6 + $0x684] sm:$0xf]  ;;  %v3273_v59 = vld [vmem:[#allocation6 + $0x690] sm:$0xf0]  ;;  %v3148_v63 = vor.u32 %v3765_v55, %v3145_v57  ;;  %v3620_v55 = vld [vmem:[#allocation6 + $0xf4] sm:$0xf0] }
  0x7d   :  { %v3829_v60 = vld [vmem:[#allocation6 + $0x784] sm:$0xf]  ;;  %v3401_v61 = vld [vmem:[#allocation6 + $0x790] sm:$0xf0]  ;;  %v3276_v0 = vor.u32 %v3797_v58, %v3273_v59  ;;  %v3652_v58 = vld [vmem:[#allocation6 + $0x1f4] sm:$0xf0] }
  0x7e   :  { %1837 = vmatpush.bf16.msrb.mxu0 %v3052_v32  ;;  %1850 = vmatpush.bf16.msrb.mxu1 %v3180_v33  ;;  %v3729_v1 = vld [vmem:[#allocation6 + $0x464] sm:$0xf]  ;;  %v3001_v2 = vld [vmem:[#allocation6 + $0x470] sm:$0xf0]  ;;  %v3404_v4 = vor.u32 %v3829_v60, %v3401_v61  ;;  %v2815_v59 = vld [vmem:[#allocation6 + $0x2e8] sm:$0xf] }
  0x7f   :  { %1863 = vmatpush.bf16.msrb.mxu2 %v3308_v34  ;;  %v3761_v3 = vld [vmem:[#allocation6 + $0x564] sm:$0xf]  ;;  %v3129_v5 = vld [vmem:[#allocation6 + $0x570] sm:$0xf0]  ;;  %v3004_v10 = vor.u32 %v3729_v1, %v3001_v2  ;;  %v3684_v60 = vld [vmem:[#allocation6 + $0x2f4] sm:$0xf0]  ;;  %v2560_v2 = vor.u32 %v3620_v55, %v2559_v53 }
  0x80   :  { %1876 = vmatpush.bf16.msrb.mxu3 %v3436_v40  ;;  %v3793_v6 = vld [vmem:[#allocation6 + $0x664] sm:$0xf]  ;;  %v3257_v7 = vld [vmem:[#allocation6 + $0x670] sm:$0xf0]  ;;  %v3132_v11 = vor.u32 %v3761_v3, %v3129_v5  ;;  %v2543_v5 = vld [vmem:[#allocation6 + $0xc8] sm:$0xf] }
  0x81   :  { %v3825_v8 = vld [vmem:[#allocation6 + $0x764] sm:$0xf]  ;;  %v3385_v9 = vld [vmem:[#allocation6 + $0x770] sm:$0xf0]  ;;  %v3260_v12 = vor.u32 %v3793_v6, %v3257_v7  ;;  %v3616_v6 = vld [vmem:[#allocation6 + $0xd4] sm:$0xf0] }
  0x82   :  { %1838 = vmatpush.bf16.msrb.mxu0 %v3036_v46  ;;  %1851 = vmatpush.bf16.msrb.mxu1 %v3164_v47  ;;  %v3725_v13 = vld [vmem:[#allocation6 + $0x444] sm:$0xf]  ;;  %v2985_v14 = vld [vmem:[#allocation6 + $0x450] sm:$0xf0]  ;;  %v3388_v16 = vor.u32 %v3825_v8, %v3385_v9  ;;  %v2671_v7 = vld [vmem:[#allocation6 + $0x1c8] sm:$0xf] }
  0x83   :  { %1864 = vmatpush.bf16.msrb.mxu2 %v3292_v48  ;;  %v3757_v15 = vld [vmem:[#allocation6 + $0x544] sm:$0xf]  ;;  %v3113_v17 = vld [vmem:[#allocation6 + $0x550] sm:$0xf0]  ;;  %v2988_v22 = vor.u32 %v3725_v13, %v2985_v14  ;;  %v3648_v9 = vld [vmem:[#allocation6 + $0x1d4] sm:$0xf0]  ;;  %v2544_v14 = vor.u32 %v3616_v6, %v2543_v5 }
  0x84   :  { %1877 = vmatpush.bf16.msrb.mxu3 %v3420_v56  ;;  %v3789_v18 = vld [vmem:[#allocation6 + $0x644] sm:$0xf]  ;;  %v3241_v19 = vld [vmem:[#allocation6 + $0x650] sm:$0xf0]  ;;  %v3116_v23 = vor.u32 %v3757_v15, %v3113_v17  ;;  %v2687_v56 = vld [vmem:[#allocation6 + $0x1e8] sm:$0xf]  ;;  %v2672_v15 = vor.u32 %v3648_v9, %v2671_v7 }
  0x85   :  { %v3821_v20 = vld [vmem:[#allocation6 + $0x744] sm:$0xf]  ;;  %v3369_v21 = vld [vmem:[#allocation6 + $0x750] sm:$0xf0]  ;;  %v3244_v24 = vor.u32 %v3789_v18, %v3241_v19  ;;  %v2688_v3 = vor.u32 %v3652_v58, %v2687_v56  ;;  %v3712_v13 = vld [vmem:[#allocation6 + $0x3d4] sm:$0xf0] }
  0x86   :  { %1839 = vmatpush.bf16.msrb.mxu0 %v3020_v62  ;;  %1852 = vmatpush.bf16.msrb.mxu1 %v3148_v63  ;;  %v3721_v25 = vld [vmem:[#allocation6 + $0x424] sm:$0xf]  ;;  %v2969_v26 = vld [vmem:[#allocation6 + $0x430] sm:$0xf0]  ;;  %v3372_v28 = vor.u32 %v3821_v20, %v3369_v21  ;;  %v2943_v63 = vld [vmem:[#allocation6 + $0x3e8] sm:$0xf] }
  0x87   :  { %1865 = vmatpush.bf16.msrb.mxu2 %v3276_v0  ;;  %v3753_v27 = vld [vmem:[#allocation6 + $0x524] sm:$0xf]  ;;  %v3097_v31 = vld [vmem:[#allocation6 + $0x530] sm:$0xf0]  ;;  %v2972_v38 = vor.u32 %v3721_v25, %v2969_v26  ;;  %v3716_v0 = vld [vmem:[#allocation6 + $0x3f4] sm:$0xf0] }
  0x88   :  { %1878 = vmatpush.bf16.msrb.mxu3 %v3404_v4  ;;  %v3785_v32 = vld [vmem:[#allocation6 + $0x624] sm:$0xf]  ;;  %v3225_v33 = vld [vmem:[#allocation6 + $0x630] sm:$0xf0]  ;;  %v3100_v41 = vor.u32 %v3753_v27, %v3097_v31  ;;  %v2816_v4 = vor.u32 %v3684_v60, %v2815_v59  ;;  %v2944_v8 = vor.u32 %v3716_v0, %v2943_v63  ;;  %v2527_v17 = vld [vmem:[#allocation6 + $0xa8] sm:$0xf] }
  0x89   :  { %v3817_v34 = vld [vmem:[#allocation6 + $0x724] sm:$0xf]  ;;  %v3353_v37 = vld [vmem:[#allocation6 + $0x730] sm:$0xf0]  ;;  %v3228_v42 = vor.u32 %v3785_v32, %v3225_v33  ;;  %v3612_v18 = vld [vmem:[#allocation6 + $0xb4] sm:$0xf0] }
  0x8a   :  { %1840 = vmatpush.bf16.msrb.mxu0 %v3004_v10  ;;  %1853 = vmatpush.bf16.msrb.mxu1 %v3132_v11  ;;  %v3717_v39 = vld [vmem:[#allocation6 + $0x404] sm:$0xf]  ;;  %v2953_v40 = vld [vmem:[#allocation6 + $0x410] sm:$0xf0]  ;;  %v3356_v46 = vor.u32 %v3817_v34, %v3353_v37  ;;  %v2799_v10 = vld [vmem:[#allocation6 + $0x2c8] sm:$0xf]  ;;  %v2528_v26 = vor.u32 %v3612_v18, %v2527_v17 }
  0x8b   :  { %1866 = vmatpush.bf16.msrb.mxu2 %v3260_v12  ;;  %v3749_v43 = vld [vmem:[#allocation6 + $0x504] sm:$0xf]  ;;  %v3081_v44 = vld [vmem:[#allocation6 + $0x510] sm:$0xf0]  ;;  %v2956_v57 = vor.u32 %v3717_v39, %v2953_v40  ;;  %v3680_v11 = vld [vmem:[#allocation6 + $0x2d4] sm:$0xf0] }
  0x8c   :  { %1879 = vmatpush.bf16.msrb.mxu3 %v3388_v16  ;;  %v3781_v45 = vld [vmem:[#allocation6 + $0x604] sm:$0xf]  ;;  %v3209_v47 = vld [vmem:[#allocation6 + $0x610] sm:$0xf0]  ;;  %v3084_v61 = vor.u32 %v3749_v43, %v3081_v44  ;;  %v2927_v12 = vld [vmem:[#allocation6 + $0x3c8] sm:$0xf]  ;;  %v2800_v16 = vor.u32 %v3680_v11, %v2799_v10 }
  0x8d   :  { %v3813_v48 = vld [vmem:[#allocation6 + $0x704] sm:$0xf]  ;;  %v3337_v49 = vld [vmem:[#allocation6 + $0x710] sm:$0xf0]  ;;  %v3212_v62 = vor.u32 %v3781_v45, %v3209_v47  ;;  %v2655_v19 = vld [vmem:[#allocation6 + $0x1a8] sm:$0xf]  ;;  %v2928_v20 = vor.u32 %v3712_v13, %v2927_v12 }
  0x8e   :  { %1841 = vmatpush.bf16.msrb.mxu0 %v2988_v22  ;;  %1854 = vmatpush.bf16.msrb.mxu1 %v3116_v23  ;;  %v3340_v1 = vor.u32 %v3813_v48, %v3337_v49  ;;  %v3644_v21 = vld [vmem:[#allocation6 + $0x1b4] sm:$0xf0]  ;;  %v2783_v22 = vld [vmem:[#allocation6 + $0x2a8] sm:$0xf] }
  0x8f   :  { %1867 = vmatpush.bf16.msrb.mxu2 %v3244_v24  ;;  %v3676_v23 = vld [vmem:[#allocation6 + $0x2b4] sm:$0xf0]  ;;  %v2911_v24 = vld [vmem:[#allocation6 + $0x3a8] sm:$0xf]  ;;  %v2656_v27 = vor.u32 %v3644_v21, %v2655_v19 }
  0x90   :  { %1880 = vmatpush.bf16.msrb.mxu3 %v3372_v28  ;;  %v3708_v25 = vld [vmem:[#allocation6 + $0x3b4] sm:$0xf0]  ;;  %v2784_v28 = vor.u32 %v3676_v23, %v2783_v22  ;;  %v2511_v31 = vld [vmem:[#allocation6 + $0x88] sm:$0xf] }
  0x91   :  { %v3608_v32 = vld [vmem:[#allocation6 + $0x94] sm:$0xf0]  ;;  %v2639_v33 = vld [vmem:[#allocation6 + $0x188] sm:$0xf]  ;;  %v2912_v34 = vor.u32 %v3708_v25, %v2911_v24 }
  0x92   :  { %1842 = vmatpush.bf16.msrb.mxu0 %v2972_v38  ;;  %1855 = vmatpush.bf16.msrb.mxu1 %v3100_v41  ;;  %v3640_v37 = vld [vmem:[#allocation6 + $0x194] sm:$0xf0]  ;;  %v2767_v38 = vld [vmem:[#allocation6 + $0x288] sm:$0xf] }
  0x93   :  { %1868 = vmatpush.bf16.msrb.mxu2 %v3228_v42  ;;  %v3672_v39 = vld [vmem:[#allocation6 + $0x294] sm:$0xf0]  ;;  %v2895_v40 = vld [vmem:[#allocation6 + $0x388] sm:$0xf]  ;;  %v2512_v42 = vor.u32 %v3608_v32, %v2511_v31  ;;  %v2640_v43 = vor.u32 %v3640_v37, %v2639_v33 }
  0x94   :  { %1881 = vmatpush.bf16.msrb.mxu3 %v3356_v46  ;;  %v3704_v41 = vld [vmem:[#allocation6 + $0x394] sm:$0xf0]  ;;  %v2768_v44 = vor.u32 %v3672_v39, %v2767_v38  ;;  %v2495_v45 = vld [vmem:[#allocation6 + $0x68] sm:$0xf] }
  0x95   :  { %v3604_v46 = vld [vmem:[#allocation6 + $0x74] sm:$0xf0]  ;;  %v2623_v47 = vld [vmem:[#allocation6 + $0x168] sm:$0xf]  ;;  %v2896_v48 = vor.u32 %v3704_v41, %v2895_v40 }
  0x96   :  { %1843 = vmatpush.bf16.msrb.mxu0 %v2956_v57  ;;  %1856 = vmatpush.bf16.msrb.mxu1 %v3084_v61  ;;  %v3636_v49 = vld [vmem:[#allocation6 + $0x174] sm:$0xf0]  ;;  %v2751_v53 = vld [vmem:[#allocation6 + $0x268] sm:$0xf]  ;;  %v2496_v58 = vor.u32 %v3604_v46, %v2495_v45 }
  0x97   :  { %1869 = vmatpush.bf16.msrb.mxu2 %v3212_v62  ;;  %v3668_v55 = vld [vmem:[#allocation6 + $0x274] sm:$0xf0]  ;;  %v2879_v56 = vld [vmem:[#allocation6 + $0x368] sm:$0xf]  ;;  %v2624_v59 = vor.u32 %v3636_v49, %v2623_v47 }
  0x98   :  { %1882 = vmatpush.bf16.msrb.mxu3 %v3340_v1  ;;  %v3700_v57 = vld [vmem:[#allocation6 + $0x374] sm:$0xf0]  ;;  %v2752_v60 = vor.u32 %v3668_v55, %v2751_v53  ;;  %v2479_v61 = vld [vmem:[#allocation6 + $0x48] sm:$0xf] }
  0x99   :  { %1844 = vmatmul.bf16.vlgmr.msrb.gmra.mxu0 %v4082_v51  ;;  %1857 = vmatmul.bf16.vlgmr.msrb.gmra.mxu1 %v4086_v54  ;;  %v3600_v62 = vld [vmem:[#allocation6 + $0x54] sm:$0xf0]  ;;  %v2607_v63 = vld [vmem:[#allocation6 + $0x148] sm:$0xf]  ;;  %v2880_v0 = vor.u32 %v3700_v57, %v2879_v56 }
  0x9a   :  { %1888 = vmatpush.bf16.msra.mxu0 %v2560_v2  ;;  %1901 = vmatpush.bf16.msra.mxu1 %v2688_v3  ;;  %v3632_v1 = vld [vmem:[#allocation6 + $0x154] sm:$0xf0]  ;;  %v2735_v2 = vld [vmem:[#allocation6 + $0x248] sm:$0xf]  ;;  %v2480_v6 = vor.u32 %v3600_v62, %v2479_v61 }
  0x9b   :  { %1914 = vmatpush.bf16.msra.mxu2 %v2816_v4  ;;  %1883 = vmatmul.bf16.vlgmr.msrb.gmra.mxu3 %v4084_v52  ;;  %v3664_v3 = vld [vmem:[#allocation6 + $0x254] sm:$0xf0]  ;;  %v2863_v4 = vld [vmem:[#allocation6 + $0x348] sm:$0xf]  ;;  %v2608_v7 = vor.u32 %v3632_v1, %v2607_v63 }
  0x9c   :  { %1927 = vmatpush.bf16.msra.mxu3 %v2944_v8  ;;  %1870 = vmatmul.bf16.vlgmr.msrb.gmra.mxu2 %v4080_v50  ;;  %v3696_v5 = vld [vmem:[#allocation6 + $0x354] sm:$0xf0]  ;;  %v2736_v8 = vor.u32 %v3664_v3, %v2735_v2  ;;  %v2463_v9 = vld [vmem:[#allocation6 + $0x28] sm:$0xf] }
  0x9d   :  { %v3596_v10 = vld [vmem:[#allocation6 + $0x34] sm:$0xf0]  ;;  %v2591_v11 = vld [vmem:[#allocation6 + $0x128] sm:$0xf]  ;;  %v2864_v12 = vor.u32 %v3696_v5, %v2863_v4 }
  0x9e   :  { %1889 = vmatpush.bf16.msra.mxu0 %v2544_v14  ;;  %1902 = vmatpush.bf16.msra.mxu1 %v2672_v15  ;;  %v3628_v13 = vld [vmem:[#allocation6 + $0x134] sm:$0xf0]  ;;  %v2719_v14 = vld [vmem:[#allocation6 + $0x228] sm:$0xf]  ;;  %v2464_v18 = vor.u32 %v3596_v10, %v2463_v9 }
  0x9f   :  { %1915 = vmatpush.bf16.msra.mxu2 %v2800_v16  ;;  %v3660_v15 = vld [vmem:[#allocation6 + $0x234] sm:$0xf0]  ;;  %v2847_v16 = vld [vmem:[#allocation6 + $0x328] sm:$0xf]  ;;  %v2592_v21 = vor.u32 %v3628_v13, %v2591_v11 }
  0xa0   :  { %1928 = vmatpush.bf16.msra.mxu3 %v2928_v20  ;;  %v3692_v17 = vld [vmem:[#allocation6 + $0x334] sm:$0xf0]  ;;  %v2447_v19 = vld [vmem:[#allocation6 + $0x8] sm:$0xf]  ;;  %v2720_v22 = vor.u32 %v3660_v15, %v2719_v14 }
  0xa1   :  { %v3592_v20 = vld [vmem:[#allocation6 + $0x14] sm:$0xf0]  ;;  %v2575_v23 = vld [vmem:[#allocation6 + $0x108] sm:$0xf] }
  0xa2   :  { %1890 = vmatpush.bf16.msra.mxu0 %v2528_v26  ;;  %1903 = vmatpush.bf16.msra.mxu1 %v2656_v27  ;;  %v3624_v24 = vld [vmem:[#allocation6 + $0x114] sm:$0xf0]  ;;  %v2703_v25 = vld [vmem:[#allocation6 + $0x208] sm:$0xf]  ;;  %v2848_v26 = vor.u32 %v3692_v17, %v2847_v16  ;;  %v2448_v37 = vor.u32 %v3592_v20, %v2447_v19 }
  0xa3   :  { %1916 = vmatpush.bf16.msra.mxu2 %v2784_v28  ;;  %v3656_v27 = vld [vmem:[#allocation6 + $0x214] sm:$0xf0]  ;;  %v2831_v28 = vld [vmem:[#allocation6 + $0x308] sm:$0xf]  ;;  %v2576_v41 = vor.u32 %v3624_v24, %v2575_v23 }
  0xa4   :  { %1929 = vmatpush.bf16.msra.mxu3 %v2912_v34  ;;  %v3688_v31 = vld [vmem:[#allocation6 + $0x314] sm:$0xf0]  ;;  %v3071_v32 = vld [vmem:[#allocation6 + $0x4e8] sm:$0xf] }
  0xa5   :  { %v3748_v33 = vld [vmem:[#allocation6 + $0x4f4] sm:$0xf0]  ;;  %v3199_v34 = vld [vmem:[#allocation6 + $0x5e8] sm:$0xf]  ;;  %v2832_v45 = vor.u32 %v3688_v31, %v2831_v28 }
  0xa6   :  { %1891 = vmatpush.bf16.msra.mxu0 %v2512_v42  ;;  %1904 = vmatpush.bf16.msra.mxu1 %v2640_v43  ;;  %v3780_v38 = vld [vmem:[#allocation6 + $0x5f4] sm:$0xf0]  ;;  %v3327_v39 = vld [vmem:[#allocation6 + $0x6e8] sm:$0xf]  ;;  %v2704_v42 = vor.u32 %v3656_v27, %v2703_v25  ;;  %v3072_v46 = vor.u32 %v3748_v33, %v3071_v32 }
  0xa7   :  { %1917 = vmatpush.bf16.msra.mxu2 %v2768_v44  ;;  %v3812_v40 = vld [vmem:[#allocation6 + $0x6f4] sm:$0xf0]  ;;  %v3455_v43 = vld [vmem:[#allocation6 + $0x7e8] sm:$0xf]  ;;  %v3200_v47 = vor.u32 %v3780_v38, %v3199_v34 }
  0xa8   :  { %1930 = vmatpush.bf16.msra.mxu3 %v2896_v48  ;;  %v3844_v44 = vld [vmem:[#allocation6 + $0x7f4] sm:$0xf0]  ;;  %v3328_v48 = vor.u32 %v3812_v40, %v3327_v39  ;;  %v3055_v49 = vld [vmem:[#allocation6 + $0x4c8] sm:$0xf] }
  0xa9   :  { %v3744_v53 = vld [vmem:[#allocation6 + $0x4d4] sm:$0xf0]  ;;  %v3183_v55 = vld [vmem:[#allocation6 + $0x5c8] sm:$0xf]  ;;  %v3456_v56 = vor.u32 %v3844_v44, %v3455_v43  ;;  %v4104_v44 = vld [vmem:[#allocation8] sm:$0xf] }
  0xaa   :  { %1892 = vmatpush.bf16.msra.mxu0 %v2496_v58  ;;  %1905 = vmatpush.bf16.msra.mxu1 %v2624_v59  ;;  %v3776_v57 = vld [vmem:[#allocation6 + $0x5d4] sm:$0xf0]  ;;  %v3311_v58 = vld [vmem:[#allocation6 + $0x6c8] sm:$0xf]  ;;  %v3056_v62 = vor.u32 %v3744_v53, %v3055_v49 }
  0xab   :  { %1918 = vmatpush.bf16.msra.mxu2 %v2752_v60  ;;  %v3808_v59 = vld [vmem:[#allocation6 + $0x6d4] sm:$0xf0]  ;;  %v3439_v60 = vld [vmem:[#allocation6 + $0x7c8] sm:$0xf]  ;;  %v3184_v63 = vor.u32 %v3776_v57, %v3183_v55 }
  0xac   :  { %1931 = vmatpush.bf16.msra.mxu3 %v2880_v0  ;;  %v3840_v61 = vld [vmem:[#allocation6 + $0x7d4] sm:$0xf0]  ;;  %v3312_v0 = vor.u32 %v3808_v59, %v3311_v58  ;;  %v3039_v1 = vld [vmem:[#allocation6 + $0x4a8] sm:$0xf] }
  0xad   :  { %v3740_v2 = vld [vmem:[#allocation6 + $0x4b4] sm:$0xf0]  ;;  %v3167_v3 = vld [vmem:[#allocation6 + $0x5a8] sm:$0xf]  ;;  %v3440_v4 = vor.u32 %v3840_v61, %v3439_v60 }
  0xae   :  { %1893 = vmatpush.bf16.msra.mxu0 %v2480_v6  ;;  %1906 = vmatpush.bf16.msra.mxu1 %v2608_v7  ;;  %v3772_v5 = vld [vmem:[#allocation6 + $0x5b4] sm:$0xf0]  ;;  %v3295_v6 = vld [vmem:[#allocation6 + $0x6a8] sm:$0xf]  ;;  %v3040_v10 = vor.u32 %v3740_v2, %v3039_v1 }
  0xaf   :  { %1919 = vmatpush.bf16.msra.mxu2 %v2736_v8  ;;  %v3804_v7 = vld [vmem:[#allocation6 + $0x6b4] sm:$0xf0]  ;;  %v3423_v8 = vld [vmem:[#allocation6 + $0x7a8] sm:$0xf]  ;;  %v3168_v11 = vor.u32 %v3772_v5, %v3167_v3 }
  0xb0   :  { %1932 = vmatpush.bf16.msra.mxu3 %v2864_v12  ;;  %v3836_v9 = vld [vmem:[#allocation6 + $0x7b4] sm:$0xf0]  ;;  %v3296_v12 = vor.u32 %v3804_v7, %v3295_v6  ;;  %v3023_v13 = vld [vmem:[#allocation6 + $0x488] sm:$0xf] }
  0xb1   :  { %v3736_v14 = vld [vmem:[#allocation6 + $0x494] sm:$0xf0]  ;;  %v3151_v15 = vld [vmem:[#allocation6 + $0x588] sm:$0xf]  ;;  %v3424_v16 = vor.u32 %v3836_v9, %v3423_v8 }
  0xb2   :  { %1894 = vmatpush.bf16.msra.mxu0 %v2464_v18  ;;  %1907 = vmatpush.bf16.msra.mxu1 %v2592_v21  ;;  %v3768_v17 = vld [vmem:[#allocation6 + $0x594] sm:$0xf0]  ;;  %v3279_v18 = vld [vmem:[#allocation6 + $0x688] sm:$0xf] }
  0xb3   :  { %1920 = vmatpush.bf16.msra.mxu2 %v2720_v22  ;;  %v3800_v19 = vld [vmem:[#allocation6 + $0x694] sm:$0xf0]  ;;  %v3407_v20 = vld [vmem:[#allocation6 + $0x788] sm:$0xf]  ;;  %v3024_v22 = vor.u32 %v3736_v14, %v3023_v13  ;;  %v3152_v23 = vor.u32 %v3768_v17, %v3151_v15 }
  0xb4   :  { %1933 = vmatpush.bf16.msra.mxu3 %v2848_v26  ;;  %v3832_v21 = vld [vmem:[#allocation6 + $0x794] sm:$0xf0]  ;;  %v3280_v24 = vor.u32 %v3800_v19, %v3279_v18  ;;  %v3007_v25 = vld [vmem:[#allocation6 + $0x468] sm:$0xf] }
  0xb5   :  { %v3732_v26 = vld [vmem:[#allocation6 + $0x474] sm:$0xf0]  ;;  %v3135_v27 = vld [vmem:[#allocation6 + $0x568] sm:$0xf]  ;;  %v3408_v28 = vor.u32 %v3832_v21, %v3407_v20 }
  0xb6   :  { %1895 = vmatpush.bf16.msra.mxu0 %v2448_v37  ;;  %1908 = vmatpush.bf16.msra.mxu1 %v2576_v41  ;;  %v3764_v31 = vld [vmem:[#allocation6 + $0x574] sm:$0xf0]  ;;  %v3263_v32 = vld [vmem:[#allocation6 + $0x668] sm:$0xf]  ;;  %v3008_v38 = vor.u32 %v3732_v26, %v3007_v25  ;;  %v2689_v26 = vld [vmem:[#allocation6 + $0x1f8] sm:$0xf0] }
  0xb7   :  { %1921 = vmatpush.bf16.msra.mxu2 %v2704_v42  ;;  %v3796_v33 = vld [vmem:[#allocation6 + $0x674] sm:$0xf0]  ;;  %v3391_v34 = vld [vmem:[#allocation6 + $0x768] sm:$0xf]  ;;  %v3136_v40 = vor.u32 %v3764_v31, %v3135_v27  ;;  %v3682_v27 = vld [vmem:[#allocation6 + $0x2ec] sm:$0xf] }
  0xb8   :  { %1934 = vmatpush.bf16.msra.mxu3 %v2832_v45  ;;  %v3828_v37 = vld [vmem:[#allocation6 + $0x774] sm:$0xf0]  ;;  %v2991_v39 = vld [vmem:[#allocation6 + $0x448] sm:$0xf]  ;;  %v3264_v41 = vor.u32 %v3796_v33, %v3263_v32 }
  0xb9   :  { %1896 = vmatmul.bf16.vlgmr.msra.gmra.mxu0 %v4072_v35  ;;  %1909 = vmatmul.bf16.vlgmr.msra.gmra.mxu1 %v4074_v36  ;;  %v3728_v42 = vld [vmem:[#allocation6 + $0x454] sm:$0xf0]  ;;  %v3119_v43 = vld [vmem:[#allocation6 + $0x548] sm:$0xf]  ;;  %v3392_v45 = vor.u32 %v3828_v37, %v3391_v34  ;;  %v3714_v34 = vld [vmem:[#allocation6 + $0x3ec] sm:$0xf] }
  0xba   :  { %1940 = vmatpush.bf16.msrb.mxu0 %v3072_v46  ;;  %1953 = vmatpush.bf16.msrb.mxu1 %v3200_v47  ;;  %v3760_v46 = vld [vmem:[#allocation6 + $0x554] sm:$0xf0]  ;;  %v3247_v47 = vld [vmem:[#allocation6 + $0x648] sm:$0xf]  ;;  %v2992_v55 = vor.u32 %v3728_v42, %v2991_v39  ;;  %v2945_v37 = vld [vmem:[#allocation6 + $0x3f8] sm:$0xf0] }
  0xbb   :  { %1966 = vmatpush.bf16.msrb.mxu2 %v3328_v48  ;;  %1935 = vmatmul.bf16.vlgmr.msra.gmra.mxu3 %v4070_v30  ;;  %v3792_v48 = vld [vmem:[#allocation6 + $0x654] sm:$0xf0]  ;;  %v3375_v49 = vld [vmem:[#allocation6 + $0x748] sm:$0xf]  ;;  %v3120_v57 = vor.u32 %v3760_v46, %v3119_v43  ;;  %v2545_v46 = vld [vmem:[#allocation6 + $0xd8] sm:$0xf0] }
  0xbc   :  { %1979 = vmatpush.bf16.msrb.mxu3 %v3456_v56  ;;  %1922 = vmatmul.bf16.vlgmr.msra.gmra.mxu2 %v4068_v29  ;;  %v3824_v53 = vld [vmem:[#allocation6 + $0x754] sm:$0xf0]  ;;  %v364_v56 = vperm.slane %v4104_v44, 0  ;;  %v3248_v58 = vor.u32 %v3792_v48, %v3247_v47  ;;  %v2975_v59 = vld [vmem:[#allocation6 + $0x428] sm:$0xf] }
  0xbd   :  { %v3724_v60 = vld [vmem:[#allocation6 + $0x434] sm:$0xf0]  ;;  %v3103_v61 = vld [vmem:[#allocation6 + $0x528] sm:$0xf]  ;;  %v3646_v47 = vld [vmem:[#allocation6 + $0x1cc] sm:$0xf] }
  0xbe   :  { %1941 = vmatpush.bf16.msrb.mxu0 %v3056_v62  ;;  %1954 = vmatpush.bf16.msrb.mxu1 %v3184_v63  ;;  %v3376_v63 = vor.u32 %v3824_v53, %v3375_v49  ;;  %v3231_v1 = vld [vmem:[#allocation6 + $0x628] sm:$0xf]  ;;  %v3788_v2 = vld [vmem:[#allocation6 + $0x634] sm:$0xf0]  ;;  %v2976_v6 = vor.u32 %v3724_v60, %v2975_v59  ;;  %v2948_v49 = vor.u32 %v3714_v34, %v2945_v37  ;;  %v2673_v53 = vld [vmem:[#allocation6 + $0x1d8] sm:$0xf0] }
  0xbf   :  { %1967 = vmatpush.bf16.msrb.mxu2 %v3312_v0  ;;  %v3756_v0 = vld [vmem:[#allocation6 + $0x534] sm:$0xf0]  ;;  %v3359_v3 = vld [vmem:[#allocation6 + $0x728] sm:$0xf]  ;;  %v3666_v34 = vld [vmem:[#allocation6 + $0x26c] sm:$0xf] }
  0xc0   :  { %1980 = vmatpush.bf16.msrb.mxu3 %v3440_v4  ;;  %v3820_v4 = vld [vmem:[#allocation6 + $0x734] sm:$0xf0]  ;;  %v2959_v7 = vld [vmem:[#allocation6 + $0x408] sm:$0xf]  ;;  %v2753_v37 = vld [vmem:[#allocation6 + $0x278] sm:$0xf0] }
  0xc1   :  { %v3720_v8 = vld [vmem:[#allocation6 + $0x414] sm:$0xf0]  ;;  %v3215_v14 = vld [vmem:[#allocation6 + $0x608] sm:$0xf]  ;;  %v3360_v15 = vor.u32 %v3820_v4, %v3359_v3  ;;  %v2657_v4 = vld [vmem:[#allocation6 + $0x1b8] sm:$0xf0] }
  0xc2   :  { %1942 = vmatpush.bf16.msrb.mxu0 %v3040_v10  ;;  %1955 = vmatpush.bf16.msrb.mxu1 %v3168_v11  ;;  %v3104_v10 = vor.u32 %v3756_v0, %v3103_v61  ;;  %v3232_v11 = vor.u32 %v3788_v2, %v3231_v1  ;;  %v3752_v13 = vld [vmem:[#allocation6 + $0x514] sm:$0xf0]  ;;  %v3343_v17 = vld [vmem:[#allocation6 + $0x708] sm:$0xf]  ;;  %v2960_v25 = vor.u32 %v3720_v8, %v2959_v7  ;;  %v3610_v0 = vld [vmem:[#allocation6 + $0xac] sm:$0xf] }
  0xc3   :  { %1968 = vmatpush.bf16.msrb.mxu2 %v3296_v12  ;;  %v3087_v12 = vld [vmem:[#allocation6 + $0x508] sm:$0xf]  ;;  %v3816_v18 = vld [vmem:[#allocation6 + $0x714] sm:$0xf0]  ;;  %v2529_v1 = vld [vmem:[#allocation6 + $0xb8] sm:$0xf0] }
  0xc4   :  { %1981 = vmatpush.bf16.msrb.mxu3 %v3424_v16  ;;  %v3784_v16 = vld [vmem:[#allocation6 + $0x614] sm:$0xf0]  ;;  %v3088_v32 = vor.u32 %v3752_v13, %v3087_v12  ;;  %v3344_v39 = vor.u32 %v3816_v18, %v3343_v17  ;;  %v3642_v2 = vld [vmem:[#allocation6 + $0x1ac] sm:$0xf]  ;;  %v2913_v8 = vld [vmem:[#allocation6 + $0x3b8] sm:$0xf0] }
  0xc5   :  { %v3216_v33 = vor.u32 %v3784_v16, %v3215_v14  ;;  %v3706_v7 = vld [vmem:[#allocation6 + $0x3ac] sm:$0xf]  ;;  %v2513_v13 = vld [vmem:[#allocation6 + $0x98] sm:$0xf0] }
  0xc6   :  { %1943 = vmatpush.bf16.msrb.mxu0 %v3024_v22  ;;  %1956 = vmatpush.bf16.msrb.mxu1 %v3152_v23  ;;  %v1702_v62 = vpop.f32.mrf.mxu1  ;;  %v1689_v5 = vpop.f32.mrf.mxu0  ;;  %v3618_v22 = vld [vmem:[#allocation6 + $0xec] sm:$0xf]  ;;  %v2561_v23 = vld [vmem:[#allocation6 + $0xf8] sm:$0xf0] }
  0xc7   :  { %1969 = vmatpush.bf16.msrb.mxu2 %v3280_v24  ;;  %v1690_v9 = vadd.f32 %v1689_v5, %v364_v56  ;;  %v3650_v24 = vld [vmem:[#allocation6 + $0x1ec] sm:$0xf]  ;;  %v2801_v56 = vld [vmem:[#allocation6 + $0x2d8] sm:$0xf0] }
  0xc8   :  { %1982 = vmatpush.bf16.msrb.mxu3 %v3408_v28  ;;  %v2817_v28 = vld [vmem:[#allocation6 + $0x2f8] sm:$0xf0]  ;;  %v2692_v42 = vor.u32 %v3650_v24, %v2689_v26  ;;  %v3674_v5 = vld [vmem:[#allocation6 + $0x2ac] sm:$0xf] }
  0xc9   :  { %v1703_v19 = vadd.f32 %v1702_v62, %v1690_v9  ;;  %v2820_v43 = vor.u32 %v3682_v27, %v2817_v28  ;;  %v2676_v62 = vor.u32 %v3646_v47, %v2673_v53  ;;  %v2532_v9 = vor.u32 %v3610_v0, %v2529_v1  ;;  %v3606_v12 = vld [vmem:[#allocation6 + $0x8c] sm:$0xf]  ;;  %v2641_v16 = vld [vmem:[#allocation6 + $0x198] sm:$0xf0] }
  0xca   :  { %1944 = vmatpush.bf16.msrb.mxu0 %v3008_v38  ;;  %1957 = vmatpush.bf16.msrb.mxu1 %v3136_v40  ;;  %v2564_v40 = vor.u32 %v3618_v22, %v2561_v23  ;;  %v3638_v14 = vld [vmem:[#allocation6 + $0x18c] sm:$0xf]  ;;  %v2769_v18 = vld [vmem:[#allocation6 + $0x298] sm:$0xf0] }
  0xcb   :  { %1970 = vmatpush.bf16.msrb.mxu2 %v3264_v41  ;;  %v1715_v20 = vpop.f32.mrf.mxu2  ;;  %v1728_v21 = vpop.f32.mrf.mxu3  ;;  %v3670_v17 = vld [vmem:[#allocation6 + $0x28c] sm:$0xf]  ;;  %v2644_v23 = vor.u32 %v3638_v14, %v2641_v16  ;;  %v2497_v26 = vld [vmem:[#allocation6 + $0x78] sm:$0xf0] }
  0xcc   :  { %1983 = vmatpush.bf16.msrb.mxu3 %v3392_v45  ;;  %v1716_v31 = vadd.f32 %v1715_v20, %v1703_v19  ;;  %v3614_v45 = vld [vmem:[#allocation6 + $0xcc] sm:$0xf]  ;;  %v2897_v20 = vld [vmem:[#allocation6 + $0x398] sm:$0xf0]  ;;  %v2772_v24 = vor.u32 %v3670_v17, %v2769_v18 }
  0xcd   :  { %v2548_v59 = vor.u32 %v3614_v45, %v2545_v46  ;;  %v3702_v19 = vld [vmem:[#allocation6 + $0x38c] sm:$0xf]  ;;  %v2756_v45 = vor.u32 %v3666_v34, %v2753_v37  ;;  %v2481_v47 = vld [vmem:[#allocation6 + $0x58] sm:$0xf0] }
  0xce   :  { %1945 = vmatpush.bf16.msrb.mxu0 %v2992_v55  ;;  %1958 = vmatpush.bf16.msrb.mxu1 %v3120_v57  ;;  %v1704_v38 = vpop.f32.mrf.mxu1  ;;  %v4107_v41 = vadd.f32 %v1728_v21, %v1716_v31  ;;  %v1691_v48 = vpop.f32.mrf.mxu0  ;;  %v3678_v55 = vld [vmem:[#allocation6 + $0x2cc] sm:$0xf]  ;;  %v2516_v21 = vor.u32 %v3606_v12, %v2513_v13  ;;  %v2609_v53 = vld [vmem:[#allocation6 + $0x158] sm:$0xf0] }
  0xcf   :  { %1971 = vmatpush.bf16.msrb.mxu2 %v3248_v58  ;;  %v3710_v57 = vld [vmem:[#allocation6 + $0x3cc] sm:$0xf]  ;;  %v2929_v58 = vld [vmem:[#allocation6 + $0x3d8] sm:$0xf0] }
  0xd0   :  { %1984 = vmatpush.bf16.msrb.mxu3 %v3376_v63  ;;  %v2804_v63 = vor.u32 %v3678_v55, %v2801_v56  ;;  %v2932_v3 = vor.u32 %v3710_v57, %v2929_v58  ;;  %v3634_v27 = vld [vmem:[#allocation6 + $0x16c] sm:$0xf]  ;;  %v2737_v56 = vld [vmem:[#allocation6 + $0x258] sm:$0xf0] }
  0xd1   :  { %v3698_v38 = vld [vmem:[#allocation6 + $0x36c] sm:$0xf]  ;;  %v2449_v14 = vld [vmem:[#allocation6 + $0x18] sm:$0xf0] }
  0xd2   :  { %1946 = vmatpush.bf16.msrb.mxu0 %v2976_v6  ;;  %1959 = vmatpush.bf16.msrb.mxu1 %v3104_v10  ;;  %v2785_v6 = vld [vmem:[#allocation6 + $0x2b8] sm:$0xf0]  ;;  %v2660_v10 = vor.u32 %v3642_v2, %v2657_v4  ;;  %v3598_v46 = vld [vmem:[#allocation6 + $0x4c] sm:$0xf] }
  0xd3   :  { %1972 = vmatpush.bf16.msrb.mxu2 %v3232_v11  ;;  %v1717_v60 = vpop.f32.mrf.mxu2  ;;  %v1730_v61 = vpop.f32.mrf.mxu3  ;;  %v2788_v11 = vor.u32 %v3674_v5, %v2785_v6  ;;  %v3630_v48 = vld [vmem:[#allocation6 + $0x14c] sm:$0xf]  ;;  %v2577_v18 = vld [vmem:[#allocation6 + $0x118] sm:$0xf0] }
  0xd4   :  { %1985 = vmatpush.bf16.msrb.mxu3 %v3360_v15  ;;  %v2916_v15 = vor.u32 %v3706_v7, %v2913_v8  ;;  %v3662_v55 = vld [vmem:[#allocation6 + $0x24c] sm:$0xf]  ;;  %v2865_v60 = vld [vmem:[#allocation6 + $0x358] sm:$0xf0]  ;;  %v2484_v61 = vor.u32 %v3598_v46, %v2481_v47  ;;  %v2612_v0 = vor.u32 %v3630_v48, %v2609_v53 }
  0xd5   :  { %v2740_v1 = vor.u32 %v3662_v55, %v2737_v56  ;;  %v3594_v2 = vld [vmem:[#allocation6 + $0x2c] sm:$0xf]  ;;  %v2593_v7 = vld [vmem:[#allocation6 + $0x138] sm:$0xf0] }
  0xd6   :  { %1947 = vmatpush.bf16.msrb.mxu0 %v2960_v25  ;;  %1960 = vmatpush.bf16.msrb.mxu1 %v3088_v32  ;;  %v1741_v22 = vpop.f32.mrf.mxu0  ;;  %v3602_v25 = vld [vmem:[#allocation6 + $0x6c] sm:$0xf]  ;;  %v1754_v31 = vpop.f32.mrf.mxu1  ;;  %v2900_v32 = vor.u32 %v3702_v19, %v2897_v20  ;;  %v3329_v34 = vld [vmem:[#allocation6 + $0x6f8] sm:$0xf0] }
  0xd7   :  { %1973 = vmatpush.bf16.msrb.mxu2 %v3216_v33  ;;  %v1742_v28 = vadd.f32 %v1741_v22, %v4107_v41  ;;  %v2625_v33 = vld [vmem:[#allocation6 + $0x178] sm:$0xf0]  ;;  %v3626_v4 = vld [vmem:[#allocation6 + $0x12c] sm:$0xf] }
  0xd8   :  { %1986 = vmatpush.bf16.msrb.mxu3 %v3344_v39  ;;  %v2881_v39 = vld [vmem:[#allocation6 + $0x378] sm:$0xf0]  ;;  %v3658_v8 = vld [vmem:[#allocation6 + $0x22c] sm:$0xf] }
  0xd9   :  { %1948 = vmatmul.bf16.vlgmr.msrb.gmra.mxu0 %v4082_v51  ;;  %1961 = vmatmul.bf16.vlgmr.msrb.gmra.mxu1 %v4086_v54  ;;  %v2884_v41 = vor.u32 %v3698_v38, %v2881_v39  ;;  %v3590_v13 = vld [vmem:[#allocation6 + $0xc] sm:$0xf]  ;;  %v2705_v22 = vld [vmem:[#allocation6 + $0x218] sm:$0xf0] }
  0xda   :  { %1992 = vmatpush.bf16.msra.mxu0 %v2564_v40  ;;  %2005 = vmatpush.bf16.msra.mxu1 %v2692_v42  ;;  %v1755_v40 = vadd.f32 %v1754_v31, %v1742_v28  ;;  %v2500_v42 = vor.u32 %v3602_v25, %v2497_v26  ;;  %v3622_v17 = vld [vmem:[#allocation6 + $0x10c] sm:$0xf]  ;;  %v2452_v31 = vor.u32 %v3590_v13, %v2449_v14  ;;  %v3057_v48 = vld [vmem:[#allocation6 + $0x4d8] sm:$0xf0] }
  0xdb   :  { %2018 = vmatpush.bf16.msra.mxu2 %v2820_v43  ;;  %1987 = vmatmul.bf16.vlgmr.msrb.gmra.mxu3 %v4084_v52  ;;  %v2628_v43 = vor.u32 %v3634_v27, %v2625_v33  ;;  %v3654_v19 = vld [vmem:[#allocation6 + $0x20c] sm:$0xf]  ;;  %v3073_v27 = vld [vmem:[#allocation6 + $0x4f8] sm:$0xf0]  ;;  %v2580_v37 = vor.u32 %v3622_v17, %v2577_v18 }
  0xdc   :  { %2031 = vmatpush.bf16.msra.mxu3 %v2948_v49  ;;  %1974 = vmatmul.bf16.vlgmr.msrb.gmra.mxu2 %v4080_v50  ;;  %v3746_v26 = vld [vmem:[#allocation6 + $0x4ec] sm:$0xf]  ;;  %v2708_v38 = vor.u32 %v3654_v19, %v2705_v22  ;;  %v3185_v53 = vld [vmem:[#allocation6 + $0x5d8] sm:$0xf0] }
  0xdd   :  { %v3778_v28 = vld [vmem:[#allocation6 + $0x5ec] sm:$0xf]  ;;  %v3313_v56 = vld [vmem:[#allocation6 + $0x6d8] sm:$0xf0] }
  0xde   :  { %1993 = vmatpush.bf16.msra.mxu0 %v2548_v59  ;;  %2006 = vmatpush.bf16.msra.mxu1 %v2676_v62  ;;  %v1780_v58 = vpop.f32.mrf.mxu3  ;;  %v3694_v59 = vld [vmem:[#allocation6 + $0x34c] sm:$0xf]  ;;  %v1756_v5 = vpop.f32.mrf.mxu1  ;;  %v3153_v14 = vld [vmem:[#allocation6 + $0x598] sm:$0xf0] }
  0xdf   :  { %2019 = vmatpush.bf16.msra.mxu2 %v2804_v63  ;;  %v1767_v49 = vpop.f32.mrf.mxu2  ;;  %v1743_v63 = vpop.f32.mrf.mxu0  ;;  %v2868_v6 = vor.u32 %v3694_v59, %v2865_v60  ;;  %v3810_v33 = vld [vmem:[#allocation6 + $0x6ec] sm:$0xf]  ;;  %v3297_v5 = vld [vmem:[#allocation6 + $0x6b8] sm:$0xf0] }
  0xe0   :  { %2032 = vmatpush.bf16.msra.mxu3 %v2932_v3  ;;  %v1768_v57 = vadd.f32 %v1767_v49, %v1755_v40  ;;  %v2465_v3 = vld [vmem:[#allocation6 + $0x38] sm:$0xf0]  ;;  %v3842_v39 = vld [vmem:[#allocation6 + $0x7ec] sm:$0xf]  ;;  %v3332_v46 = vor.u32 %v3810_v33, %v3329_v34 }
  0xe1   :  { %v2468_v12 = vor.u32 %v3594_v2, %v2465_v3  ;;  %v3457_v40 = vld [vmem:[#allocation6 + $0x7f8] sm:$0xf0]  ;;  %v3742_v47 = vld [vmem:[#allocation6 + $0x4cc] sm:$0xf] }
  0xe2   :  { %1994 = vmatpush.bf16.msra.mxu0 %v2532_v9  ;;  %2007 = vmatpush.bf16.msra.mxu1 %v2660_v10  ;;  %v4114_v62 = vadd.f32 %v1780_v58, %v1768_v57  ;;  %v2721_v9 = vld [vmem:[#allocation6 + $0x238] sm:$0xf0]  ;;  %v3690_v10 = vld [vmem:[#allocation6 + $0x32c] sm:$0xf]  ;;  %v3060_v59 = vor.u32 %v3742_v47, %v3057_v48 }
  0xe3   :  { %2020 = vmatpush.bf16.msra.mxu2 %v2788_v11  ;;  %v2849_v11 = vld [vmem:[#allocation6 + $0x338] sm:$0xf0]  ;;  %v2724_v16 = vor.u32 %v3658_v8, %v2721_v9  ;;  %v3774_v49 = vld [vmem:[#allocation6 + $0x5cc] sm:$0xf] }
  0xe4   :  { %2033 = vmatpush.bf16.msra.mxu3 %v2916_v15  ;;  %v2596_v15 = vor.u32 %v3626_v4, %v2593_v7  ;;  %v3806_v55 = vld [vmem:[#allocation6 + $0x6cc] sm:$0xf]  ;;  %v3441_v58 = vld [vmem:[#allocation6 + $0x7d8] sm:$0xf0]  ;;  %v3188_v60 = vor.u32 %v3774_v49, %v3185_v53 }
  0xe5   :  { %v3838_v57 = vld [vmem:[#allocation6 + $0x7cc] sm:$0xf]  ;;  %v3169_v3 = vld [vmem:[#allocation6 + $0x5b8] sm:$0xf0] }
  0xe6   :  { %1995 = vmatpush.bf16.msra.mxu0 %v2516_v21  ;;  %2008 = vmatpush.bf16.msra.mxu1 %v2644_v23  ;;  %v2852_v21 = vor.u32 %v3690_v10, %v2849_v11  ;;  %v3686_v23 = vld [vmem:[#allocation6 + $0x30c] sm:$0xf]  ;;  %v1782_v25 = vpop.f32.mrf.mxu3  ;;  %v3444_v2 = vor.u32 %v3838_v57, %v3441_v58  ;;  %v3425_v7 = vld [vmem:[#allocation6 + $0x7b8] sm:$0xf0] }
  0xe7   :  { %2021 = vmatpush.bf16.msra.mxu2 %v2772_v24  ;;  %v1769_v20 = vpop.f32.mrf.mxu2  ;;  %v2833_v24 = vld [vmem:[#allocation6 + $0x318] sm:$0xf0]  ;;  %v3738_v63 = vld [vmem:[#allocation6 + $0x4ac] sm:$0xf] }
  0xe8   :  { %2034 = vmatpush.bf16.msra.mxu3 %v2900_v32  ;;  %v3201_v32 = vld [vmem:[#allocation6 + $0x5f8] sm:$0xf0]  ;;  %v3802_v4 = vld [vmem:[#allocation6 + $0x6ac] sm:$0xf] }
  0xe9   :  { %v3300_v10 = vor.u32 %v3802_v4, %v3297_v5  ;;  %v3734_v11 = vld [vmem:[#allocation6 + $0x48c] sm:$0xf]  ;;  %v3137_v25 = vld [vmem:[#allocation6 + $0x578] sm:$0xf0]  ;;  %v365_v4 = vperm.slane %v4104_v44, 1 }
  0xea   :  { %1996 = vmatpush.bf16.msra.mxu0 %v2500_v42  ;;  %2009 = vmatpush.bf16.msra.mxu1 %v2628_v43  ;;  %v2836_v42 = vor.u32 %v3686_v23, %v2833_v24  ;;  %v3076_v43 = vor.u32 %v3746_v26, %v3073_v27  ;;  %v3830_v17 = vld [vmem:[#allocation6 + $0x78c] sm:$0xf]  ;;  %v3265_v27 = vld [vmem:[#allocation6 + $0x678] sm:$0xf0] }
  0xeb   :  { %2022 = vmatpush.bf16.msra.mxu2 %v2756_v45  ;;  %v3204_v45 = vor.u32 %v3778_v28, %v3201_v32  ;;  %v3730_v20 = vld [vmem:[#allocation6 + $0x46c] sm:$0xf]  ;;  %v3377_v49 = vld [vmem:[#allocation6 + $0x758] sm:$0xf0] }
  0xec   :  { %2035 = vmatpush.bf16.msra.mxu3 %v2884_v41  ;;  %v3460_v41 = vor.u32 %v3842_v39, %v3457_v40  ;;  %v3762_v22 = vld [vmem:[#allocation6 + $0x56c] sm:$0xf]  ;;  %v2977_v58 = vld [vmem:[#allocation6 + $0x438] sm:$0xf0] }
  0xed   :  { %v3794_v26 = vld [vmem:[#allocation6 + $0x66c] sm:$0xf]  ;;  %v3140_v33 = vor.u32 %v3762_v22, %v3137_v25  ;;  %v3860_v22 = vld [vmem:[#allocation9 + $0x78] sm:$0xff]  ;;  %v3851_v25 = vld [vmem:[#allocation9 + $0x30] sm:$0xff] }
  0xee   :  { %1997 = vmatpush.bf16.msra.mxu0 %v2484_v61  ;;  %2010 = vmatpush.bf16.msra.mxu1 %v2612_v0  ;;  %v3316_v61 = vor.u32 %v3806_v55, %v3313_v56  ;;  %v3041_v0 = vld [vmem:[#allocation6 + $0x4b8] sm:$0xf0]  ;;  %v3826_v28 = vld [vmem:[#allocation6 + $0x76c] sm:$0xf]  ;;  %v3268_v34 = vor.u32 %v3794_v26, %v3265_v27 }
  0xef   :  { %2023 = vmatpush.bf16.msra.mxu2 %v2740_v1  ;;  %v3770_v1 = vld [vmem:[#allocation6 + $0x5ac] sm:$0xf]  ;;  %v3044_v8 = vor.u32 %v3738_v63, %v3041_v0  ;;  %v3105_v63 = vld [vmem:[#allocation6 + $0x538] sm:$0xf0] }
  0xf0   :  { %2036 = vmatpush.bf16.msra.mxu3 %v2868_v6  ;;  %v3834_v6 = vld [vmem:[#allocation6 + $0x7ac] sm:$0xf]  ;;  %v3172_v9 = vor.u32 %v3770_v1, %v3169_v3  ;;  %v3233_v1 = vld [vmem:[#allocation6 + $0x638] sm:$0xf0] }
  0xf1   :  { %v3428_v13 = vor.u32 %v3834_v6, %v3425_v7  ;;  %v3758_v39 = vld [vmem:[#allocation6 + $0x54c] sm:$0xf]  ;;  %v3361_v3 = vld [vmem:[#allocation6 + $0x738] sm:$0xf0] }
  0xf2   :  { %1998 = vmatpush.bf16.msra.mxu0 %v2468_v12  ;;  %2011 = vmatpush.bf16.msra.mxu1 %v2596_v15  ;;  %v3025_v12 = vld [vmem:[#allocation6 + $0x498] sm:$0xf0]  ;;  %v3798_v15 = vld [vmem:[#allocation6 + $0x68c] sm:$0xf] }
  0xf3   :  { %2024 = vmatpush.bf16.msra.mxu2 %v2724_v16  ;;  %v3281_v16 = vld [vmem:[#allocation6 + $0x698] sm:$0xf0]  ;;  %v3822_v48 = vld [vmem:[#allocation6 + $0x74c] sm:$0xf] }
  0xf4   :  { %2037 = vmatpush.bf16.msra.mxu3 %v2852_v21  ;;  %v3284_v19 = vor.u32 %v3798_v15, %v3281_v16  ;;  %v3009_v21 = vld [vmem:[#allocation6 + $0x478] sm:$0xf0]  ;;  %v3722_v57 = vld [vmem:[#allocation6 + $0x42c] sm:$0xf] }
  0xf5   :  { %v3012_v32 = vor.u32 %v3730_v20, %v3009_v21  ;;  %v3786_v0 = vld [vmem:[#allocation6 + $0x62c] sm:$0xf]  ;;  %v2980_v5 = vor.u32 %v3722_v57, %v2977_v58  ;;  %v3852_v21 = vld [vmem:[#allocation9 + $0x38] sm:$0xff] }
  0xf6   :  { %1999 = vmatpush.bf16.msra.mxu0 %v2452_v31  ;;  %2012 = vmatpush.bf16.msra.mxu1 %v2580_v37  ;;  %v4120_v18 = vpop.f32.mrf.mxu0  ;;  %v4122_v23 = vpop.f32.mrf.mxu1  ;;  %v3393_v31 = vld [vmem:[#allocation6 + $0x778] sm:$0xf0]  ;;  %v3726_v37 = vld [vmem:[#allocation6 + $0x44c] sm:$0xf]  ;;  %v3236_v7 = vor.u32 %v3786_v0, %v3233_v1 }
  0xf7   :  { %2025 = vmatpush.bf16.msra.mxu2 %v2708_v38  ;;  %v2993_v38 = vld [vmem:[#allocation6 + $0x458] sm:$0xf0]  ;;  %v3814_v16 = vld [vmem:[#allocation6 + $0x70c] sm:$0xf] }
  0xf8   :  { %2038 = vmatpush.bf16.msra.mxu3 %v2836_v42  ;;  %v3396_v42 = vor.u32 %v3826_v28, %v3393_v31  ;;  %v3868_v26 = vld [vmem:[#allocation9 + $0xb8] sm:$0xff]  ;;  %v3858_v31 = vld [vmem:[#allocation9 + $0x68] sm:$0xff] }
  0xf9   :  { %2000 = vmatmul.bf16.vlgmr.msra.gmra.mxu0 %v4072_v35  ;;  %2013 = vmatmul.bf16.vlgmr.msra.gmra.mxu1 %v4074_v36  ;;  %v3409_v35 = vld [vmem:[#allocation6 + $0x798] sm:$0xf0] }
  0xfa   :  { %2044 = vmatpush.bf16.msrb.mxu0 %v3076_v43  ;;  %2057 = vmatpush.bf16.msrb.mxu1 %v3204_v45  ;;  %v3412_v24 = vor.u32 %v3830_v17, %v3409_v35  ;;  %v3121_v43 = vld [vmem:[#allocation6 + $0x558] sm:$0xf0]  ;;  %v3790_v45 = vld [vmem:[#allocation6 + $0x64c] sm:$0xf]  ;;  %v1794_v35 = vadd.f32 %v4120_v18, %v365_v4  ;;  %v3859_v18 = vld [vmem:[#allocation9 + $0x70] sm:$0xff] }
  0xfb   :  { %2070 = vmatpush.bf16.msrb.mxu2 %v3332_v46  ;;  %2039 = vmatmul.bf16.vlgmr.msra.gmra.mxu3 %v4070_v30  ;;  %v3028_v30 = vor.u32 %v3734_v11, %v3025_v12  ;;  %v3249_v46 = vld [vmem:[#allocation6 + $0x658] sm:$0xf0]  ;;  %v3124_v55 = vor.u32 %v3758_v39, %v3121_v43  ;;  %v3847_v43 = vld [vmem:[#allocation9 + $0x10] sm:$0xff] }
  0xfc   :  { %2083 = vmatpush.bf16.msrb.mxu3 %v3460_v41  ;;  %2026 = vmatmul.bf16.vlgmr.msra.gmra.mxu2 %v4068_v29  ;;  %v3766_v29 = vld [vmem:[#allocation6 + $0x58c] sm:$0xf]  ;;  %v2996_v41 = vor.u32 %v3726_v37, %v2993_v38  ;;  %v3252_v56 = vor.u32 %v3790_v45, %v3249_v46  ;;  %v3345_v17 = vld [vmem:[#allocation6 + $0x718] sm:$0xf0]  ;;  %v3867_v38 = vld [vmem:[#allocation9 + $0xb0] sm:$0xff] }
  0xfd   :  { %v3156_v36 = vor.u32 %v3766_v29, %v3153_v14  ;;  %v3089_v29 = vld [vmem:[#allocation6 + $0x518] sm:$0xf0]  ;;  %v3348_v20 = vor.u32 %v3814_v16, %v3345_v17  ;;  %v3863_v4 = vld [vmem:[#allocation9 + $0x90] sm:$0xff] }
  0xfe   :  { %2045 = vmatpush.bf16.msrb.mxu0 %v3060_v59  ;;  %2058 = vmatpush.bf16.msrb.mxu1 %v3188_v60  ;;  %v4126_v47 = vpop.f32.mrf.mxu3  ;;  %v1795_v53 = vpop.f32.mrf.mxu0  ;;  %v3754_v59 = vld [vmem:[#allocation6 + $0x52c] sm:$0xf]  ;;  %v3217_v14 = vld [vmem:[#allocation6 + $0x618] sm:$0xf0] }
  0xff   :  { %2071 = vmatpush.bf16.msrb.mxu2 %v3316_v61  ;;  %v4124_v40 = vpop.f32.mrf.mxu2  ;;  %v1808_v60 = vpop.f32.mrf.mxu1  ;;  %v3380_v61 = vor.u32 %v3822_v48, %v3377_v49  ;;  %v3108_v6 = vor.u32 %v3754_v59, %v3105_v63  ;;  %v3855_v48 = vld [vmem:[#allocation9 + $0x50] sm:$0xff]  ;;  %v3846_v53 = vld [vmem:[#allocation9 + $0x8] sm:$0xff]  ;;  %v3853_v63 = vld [vmem:[#allocation9 + $0x40] sm:$0xff] }
 0x100   :  { %2084 = vmatpush.bf16.msrb.mxu3 %v3444_v2  ;;  %v3818_v2 = vld [vmem:[#allocation6 + $0x72c] sm:$0xf]  ;;  %v3845_v60 = vld [vmem:[#allocation9] sm:$0xff] }
 0x101   :  { %v3364_v12 = vor.u32 %v3818_v2, %v3361_v3 }
 0x102   :  { %2046 = vmatpush.bf16.msrb.mxu0 %v3044_v8  ;;  %2059 = vmatpush.bf16.msrb.mxu1 %v3172_v9  ;;  %v3718_v8 = vld [vmem:[#allocation6 + $0x40c] sm:$0xf]  ;;  %v2961_v9 = vld [vmem:[#allocation6 + $0x418] sm:$0xf0] }
 0x103   :  { %2072 = vmatpush.bf16.msrb.mxu2 %v3300_v10  ;;  %v3750_v10 = vld [vmem:[#allocation6 + $0x50c] sm:$0xf] }
 0x104   :  { %2085 = vmatpush.bf16.msrb.mxu3 %v3428_v13  ;;  %v3782_v13 = vld [vmem:[#allocation6 + $0x60c] sm:$0xf] }
 0x106   :  { %2047 = vmatpush.bf16.msrb.mxu0 %v3028_v30  ;;  %2060 = vmatpush.bf16.msrb.mxu1 %v3156_v36  ;;  %v1834_v15 = vpop.f32.mrf.mxu3  ;;  %v2964_v30 = vor.u32 %v3718_v8, %v2961_v9  ;;  %v3092_v36 = vor.u32 %v3750_v10, %v3089_v29  ;;  %v3861_v10 = vld [vmem:[#allocation9 + $0x80] sm:$0xff] }
 0x107   :  { %2073 = vmatpush.bf16.msrb.mxu2 %v3284_v19  ;;  %v1821_v11 = vpop.f32.mrf.mxu2  ;;  %v3220_v19 = vor.u32 %v3782_v13, %v3217_v14 }
 0x108   :  { %2086 = vmatpush.bf16.msrb.mxu3 %v3412_v24  ;;  %v1807_v24 = vadd.f32 %v4122_v23, %v1794_v35  ;;  %v3850_v23 = vld [vmem:[#allocation9 + $0x28] sm:$0xff] }
 0x10a   :  { %2048 = vmatpush.bf16.msrb.mxu0 %v3012_v32  ;;  %2061 = vmatpush.bf16.msrb.mxu1 %v3140_v33  ;;  %v1820_v27 = vadd.f32 %v4124_v40, %v1807_v24  ;;  %v3849_v32 = vld [vmem:[#allocation9 + $0x20] sm:$0xff] }
 0x10b   :  { %2074 = vmatpush.bf16.msrb.mxu2 %v3268_v34 }
 0x10c   :  { %2087 = vmatpush.bf16.msrb.mxu3 %v3396_v42  ;;  %v1833_v28 = vadd.f32 %v4126_v47, %v1820_v27  ;;  %v3866_v42 = vld [vmem:[#allocation9 + $0xa8] sm:$0xff]  ;;  %v3865_v47 = vld [vmem:[#allocation9 + $0xa0] sm:$0xff] }
 0x10e   :  { %2049 = vmatpush.bf16.msrb.mxu0 %v2996_v41  ;;  %2062 = vmatpush.bf16.msrb.mxu1 %v3124_v55  ;;  %v3864_v55 = vld [vmem:[#allocation9 + $0x98] sm:$0xff] }
 0x10f   :  { %2075 = vmatpush.bf16.msrb.mxu2 %v3252_v56  ;;  %v3854_v56 = vld [vmem:[#allocation9 + $0x48] sm:$0xff] }
 0x110   :  { %2088 = vmatpush.bf16.msrb.mxu3 %v3380_v61  ;;  %v2096_v61 = vmax.f32 %v4114_v62, 0.0  ;;  %v366_v62 = vperm.slane %v4104_v44, 2 }
 0x112   :  { %2050 = vmatpush.bf16.msrb.mxu0 %v2980_v5  ;;  %2063 = vmatpush.bf16.msrb.mxu1 %v3108_v6  ;;  %v2100_v1 = vpack.c.bf16 %v2096_v61, %v2096_v61 }
 0x113   :  { %2076 = vmatpush.bf16.msrb.mxu2 %v3236_v7  ;;  %v3862_v7 = vld [vmem:[#allocation9 + $0x88] sm:$0xff] }
 0x114   :  { %2089 = vmatpush.bf16.msrb.mxu3 %v3364_v12 }
 0x116   :  { %2051 = vmatpush.bf16.msrb.mxu0 %v2964_v30  ;;  %2064 = vmatpush.bf16.msrb.mxu1 %v3092_v36  ;;  %v1845_v33 = vpop.f32.mrf.mxu0  ;;  %v1858_v37 = vpop.f32.mrf.mxu1 }
 0x117   :  { %2077 = vmatpush.bf16.msrb.mxu2 %v3220_v19  ;;  %v1846_v34 = vadd.f32 %v1845_v33, %v1833_v28  ;;  %v3872_v33 = vld [vmem:[#allocation9 + $0xd8] sm:$0xff] }
 0x118   :  { %2090 = vmatpush.bf16.msrb.mxu3 %v3348_v20 }
 0x119   :  { %2052 = vmatmul.bf16.vlgmr.msrb.gmra.mxu0 %v4082_v51  ;;  %2065 = vmatmul.bf16.vlgmr.msrb.gmra.mxu1 %v4086_v54  ;;  %v3857_v51 = vld [vmem:[#allocation9 + $0x60] sm:$0xff]  ;;  %v1859_v54 = vadd.f32 %v1858_v37, %v1846_v34 }
 0x11a   :  { %2364 = vmatpush.bf16.msra.mxu0 %v3852_v21  ;;  %2377 = vmatpush.bf16.msra.mxu1 %v3860_v22  ;;  %v3876_v21 = vld [vmem:[#allocation9 + $0xf8] sm:$0xff] }
 0x11b   :  { %2078 = vmatmul.bf16.vlgmr.msrb.gmra.mxu2 %v4080_v50  ;;  %2091 = vmatmul.bf16.vlgmr.msrb.gmra.mxu3 %v4084_v52  ;;  %v3848_v50 = vld [vmem:[#allocation9 + $0x18] sm:$0xff] }
 0x11c   :  { %2390 = vmatpush.bf16.msra.mxu2 %v3868_v26  ;;  %v3856_v52 = vld [vmem:[#allocation9 + $0x58] sm:$0xff]  ;;  %2403 = vmatpush.bf16.msra.mxu3 %v3876_v21 }
 0x11e   :  { %2365 = vmatpush.bf16.msra.mxu0 %v3851_v25  ;;  %2378 = vmatpush.bf16.msra.mxu1 %v3859_v18  ;;  %v1884_v40 = vpop.f32.mrf.mxu3  ;;  %v1847_v46 = vpop.f32.mrf.mxu0  ;;  %v3875_v25 = vld [vmem:[#allocation9 + $0xf0] sm:$0xff] }
 0x11f   :  { %v1871_v39 = vpop.f32.mrf.mxu2  ;;  %v1860_v49 = vpop.f32.mrf.mxu1 }
 0x120   :  { %2391 = vmatpush.bf16.msra.mxu2 %v3867_v38  ;;  %v1872_v45 = vadd.f32 %v1871_v39, %v1859_v54  ;;  %2404 = vmatpush.bf16.msra.mxu3 %v3875_v25  ;;  %v3870_v38 = vld [vmem:[#allocation9 + $0xc8] sm:$0xff]  ;;  %v3869_v39 = vld [vmem:[#allocation9 + $0xc0] sm:$0xff] }
 0x122   :  { %2366 = vmatpush.bf16.msra.mxu0 %v3850_v23  ;;  %2379 = vmatpush.bf16.msra.mxu1 %v3858_v31  ;;  %v1885_v41 = vadd.f32 %v1884_v40, %v1872_v45  ;;  %v3874_v23 = vld [vmem:[#allocation9 + $0xe8] sm:$0xff] }
 0x124   :  { %2392 = vmatpush.bf16.msra.mxu2 %v3866_v42  ;;  %v2097_v59 = vmax.f32 %v1885_v41, 0.0  ;;  %2405 = vmatpush.bf16.msra.mxu3 %v3874_v23  ;;  %v367_v42 = vperm.slane %v4104_v44, 3 }
 0x126   :  { %2367 = vmatpush.bf16.msra.mxu0 %v3849_v32  ;;  %2380 = vmatpush.bf16.msra.mxu1 %v3857_v51  ;;  %v1886_v58 = vpop.f32.mrf.mxu3  ;;  %v2101_v0 = vpack.c.bf16 %v2097_v59, %v2097_v59  ;;  %v3873_v32 = vld [vmem:[#allocation9 + $0xe0] sm:$0xff]  ;;  %v3871_v51 = vld [vmem:[#allocation9 + $0xd0] sm:$0xff] }
 0x127   :  { %v1873_v57 = vpop.f32.mrf.mxu2 }
 0x128   :  { %2393 = vmatpush.bf16.msra.mxu2 %v3865_v47  ;;  %2406 = vmatpush.bf16.msra.mxu3 %v3873_v32 }
 0x12a   :  { %2368 = vmatpush.bf16.msra.mxu0 %v3848_v50  ;;  %2381 = vmatpush.bf16.msra.mxu1 %v3856_v52 }
 0x12c   :  { %2394 = vmatpush.bf16.msra.mxu2 %v3864_v55  ;;  %2407 = vmatpush.bf16.msra.mxu3 %v3872_v33 }
 0x12e   :  { %2369 = vmatpush.bf16.msra.mxu0 %v3847_v43  ;;  %2382 = vmatpush.bf16.msra.mxu1 %v3855_v48 }
 0x130   :  { %2395 = vmatpush.bf16.msra.mxu2 %v3863_v4  ;;  %2408 = vmatpush.bf16.msra.mxu3 %v3871_v51 }
 0x132   :  { %2370 = vmatpush.bf16.msra.mxu0 %v3846_v53  ;;  %2383 = vmatpush.bf16.msra.mxu1 %v3854_v56 }
 0x134   :  { %2396 = vmatpush.bf16.msra.mxu2 %v3862_v7  ;;  %2409 = vmatpush.bf16.msra.mxu3 %v3870_v38 }
 0x136   :  { %2371 = vmatpush.bf16.msra.mxu0 %v3845_v60  ;;  %2384 = vmatpush.bf16.msra.mxu1 %v3853_v63  ;;  %v1897_v2 = vpop.f32.mrf.mxu0  ;;  %v1910_v3 = vpop.f32.mrf.mxu1 }
 0x137   :  { %v1898_v29 = vadd.f32 %v1897_v2, %v366_v62 }
 0x138   :  { %2397 = vmatpush.bf16.msra.mxu2 %v3861_v10  ;;  %2410 = vmatpush.bf16.msra.mxu3 %v3869_v39 }
 0x139   :  { %2372 = vmatmul.bf16.vlgmr.msra.gmra.mxu0 %v2100_v1  ;;  %2385 = vmatmul.bf16.vlgmr.msra.gmra.mxu1 %v2101_v0  ;;  %v1911_v13 = vadd.f32 %v1910_v3, %v1898_v29  ;;  %v3887_v3 = vld [vmem:[%s4150_s4] ss:$0 sm:$0xff] }
 0x13e   :  { %v1936_v6 = vpop.f32.mrf.mxu3  ;;  %v1899_v8 = vpop.f32.mrf.mxu0 }
 0x13f   :  { %v1923_v5 = vpop.f32.mrf.mxu2  ;;  %v1912_v9 = vpop.f32.mrf.mxu1 }
 0x140   :  { %v1924_v14 = vadd.f32 %v1923_v5, %v1911_v13 }
 0x142   :  { %v1937_v15 = vadd.f32 %v1936_v6, %v1924_v14 }
 0x146   :  { %v1938_v12 = vpop.f32.mrf.mxu3 }
 0x147   :  { %v1925_v11 = vpop.f32.mrf.mxu2 }
 0x156   :  { %v1949_v16 = vpop.f32.mrf.mxu0  ;;  %v1962_v35 = vpop.f32.mrf.mxu1 }
 0x157   :  { %v1950_v17 = vadd.f32 %v1949_v16, %v1937_v15 }
 0x159   :  { %v1963_v30 = vadd.f32 %v1962_v35, %v1950_v17 }
 0x15e   :  { %v1988_v20 = vpop.f32.mrf.mxu3  ;;  %v1951_v24 = vpop.f32.mrf.mxu0 }
 0x15f   :  { %v1975_v36 = vpop.f32.mrf.mxu2  ;;  %v1964_v26 = vpop.f32.mrf.mxu1 }
 0x160   :  { %v1976_v19 = vadd.f32 %v1975_v36, %v1963_v30 }
 0x162   :  { %v1989_v22 = vadd.f32 %v1988_v20, %v1976_v19 }
 0x164   :  { %v2098_v18 = vmax.f32 %v1989_v22, 0.0 }
 0x166   :  { %v2102_v27 = vpack.c.bf16 %v2098_v18, %v2098_v18  ;;  %v1990_v31 = vpop.f32.mrf.mxu3 }
 0x167   :  { %v1977_v28 = vpop.f32.mrf.mxu2 }
 0x168   :  { %2398 = vmatmul.bf16.vlgmr.msra.gmra.mxu2 %v2102_v27 }
 0x176   :  { %v2001_v34 = vpop.f32.mrf.mxu0  ;;  %v2014_v37 = vpop.f32.mrf.mxu1 }
 0x177   :  { %v2002_v46 = vadd.f32 %v2001_v34, %v367_v42 }
 0x179   :  { %v2015_v47 = vadd.f32 %v2014_v37, %v2002_v46 }
 0x17e   :  { %v2040_v54 = vpop.f32.mrf.mxu3  ;;  %v2003_v52 = vpop.f32.mrf.mxu0 }
 0x17f   :  { %v2027_v50 = vpop.f32.mrf.mxu2  ;;  %v2016_v40 = vpop.f32.mrf.mxu1 }
 0x180   :  { %v2028_v48 = vadd.f32 %v2027_v50, %v2015_v47 }
 0x182   :  { %v2041_v49 = vadd.f32 %v2040_v54, %v2028_v48 }
 0x186   :  { %v2042_v45 = vpop.f32.mrf.mxu3 }
 0x187   :  { %v2029_v43 = vpop.f32.mrf.mxu2 }
 0x196   :  { %v2053_v41 = vpop.f32.mrf.mxu0  ;;  %v2066_v53 = vpop.f32.mrf.mxu1 }
 0x197   :  { %v2054_v55 = vadd.f32 %v2053_v41, %v2041_v49 }
 0x199   :  { %v2067_v56 = vadd.f32 %v2066_v53, %v2054_v55 }
 0x19e   :  { %v2079_v57 = vpop.f32.mrf.mxu2  ;;  %v2092_v59 = vpop.f32.mrf.mxu3 }
 0x19f   :  { %v2080_v58 = vadd.f32 %v2079_v57, %v2067_v56  ;;  %v2055_v60 = vpop.f32.mrf.mxu0  ;;  %v2068_v61 = vpop.f32.mrf.mxu1 }
 0x1a1   :  { %v2093_v63 = vadd.f32 %v2092_v59, %v2080_v58 }
 0x1a3   :  { %v2099_v0 = vmax.f32 %v2093_v63, 0.0 }
 0x1a5   :  { %v2103_v1 = vpack.c.bf16 %v2099_v0, %v2099_v0 }
 0x1a6   :  { %v2081_v2 = vpop.f32.mrf.mxu2  ;;  %v2094_v44 = vpop.f32.mrf.mxu3 }
 0x1a7   :  { %2411 = vmatmul.bf16.vlgmr.msra.gmra.mxu3 %v2103_v1 }
 0x1b6   :  { %v2373_v4 = vpop.f32.mrf.mxu0  ;;  %v2386_v6 = vpop.f32.mrf.mxu1 }
 0x1b7   :  { %v2374_v5 = vadd.f32 %v3887_v3, %v2373_v4 }
 0x1b9   :  { %v2387_v7 = vadd.f32 %v2386_v6, %v2374_v5 }
 0x1be   :  { %v2375_v8 = vpop.f32.mrf.mxu0  ;;  %v2388_v9 = vpop.f32.mrf.mxu1 }
 0x1eb   :  { %v2399_v10 = vpop.f32.mrf.mxu2 }
 0x1ec   :  { %v2400_v11 = vadd.f32 %v2399_v10, %v2387_v7 }
 0x1f3   :  { %v2401_v62 = vpop.f32.mrf.mxu2 }
 0x22a   :  { %v2412_v12 = vpop.f32.mrf.mxu3 }
 0x22b   :  { %v2413_v29 = vadd.f32 %v2412_v12, %v2400_v11 }
 0x22d   :  { %v2416_v13 = vpack.c.bf16 %v2413_v29, %v2413_v29 }
 0x22f   :  { %2417 = vst [vmem:[#allocation11] sm:$0xf] %v2416_v13 }
 0x230   :  { %2428 = dma.vmem_to_hbm [thread:$0]  %s2424_s16, 64, %s2426_s19, [#allocation5]  }
 0x232   :  { %v2414_v14 = vpop.f32.mrf.mxu3 }
 0x233   :  { %4014 = dma.done.wait [#allocation5], 64  }
 0x234   :  { %4015 = vsyncadd [#allocation5], 4294967232 }
 0x235   :  { %2433 = vsyncpa [#allocation4], 1 }
 0x236   :  { %2434 = vsyncpa [#allocation7], 1 }
 0x237   :  { %2435 = vsyncpa [#allocation10], 1 }
 0x238   :  { %2436 = vsyncpa [#allocation5], 1 }

</bundles_post_ra>
